<compile_context>
chip_gen: v6e
topology: v6e:2x2x1
jax: 0.10.0
libtpu: 0.0.40
codegen_flags: <defaults>
</compile_context>

<pallas_src>
import functools

import jax
import jax.numpy as jnp
from jax.experimental import pallas as pl
from jax.experimental.pallas import tpu as pltpu


# ----------------------------- Pallas kernel ---------------------------------
def decoder_step_kernel(ids_ref,                              # SMEM [T, B] int32 (scalar prefetch)
                        hid0_ref, enc_ref, mask_ref, emb_tab_ref,
                        w_ah_ref, w_ae_ref, b_attn_ref, v_ref,
                        w_ie_ref, w_iw_ref, b_ih_ref, w_hh_ref, b_hh_ref,
                        w_oh_ref, w_ow_ref, w_oe_ref, b_out_ref,
                        pred_ref, hid_out_ref, a_ref,          # per-step [B,V] / [B,Hd] / [B,S]
                        h_scratch, emb_scratch):               # VMEM carry / gather buffer
    t = pl.program_id(0)

    # initialize the recurrent carry from the provided hidden state
    @pl.when(t == 0)
    def _():
        h_scratch[...] = hid0_ref[...]

    enc = enc_ref[...]                     # [B, S, He2]  (resident; permuted once in wrapper)
    B, S, He2 = enc.shape
    hid = h_scratch[...]                   # [B, Hd]
    Hd = hid.shape[1]

    # ---------- embedding: SMEM-indexed row gather (dropout = identity) -------
    for b in range(B):                     # B is small & static
        tok = ids_ref[t, b]                # scalar read from SMEM
        emb_scratch[pl.ds(b, 1), :] = emb_tab_ref[tok]   # dynamic row of [V,1,E] table
    emb = emb_scratch[...]                 # [B, E]

    # ---------------- attention: softmax(v . tanh(W_h h + W_e enc)) -----------
    h_part = jnp.dot(hid, w_ah_ref[...],
                     preferred_element_type=jnp.float32) + b_attn_ref[...]      # [B, Hd]
    e_part = jnp.dot(enc.reshape(B * S, He2), w_ae_ref[...],
                     preferred_element_type=jnp.float32).reshape(B, S, Hd)
    energy = jnp.tanh(e_part + h_part[:, None, :])                              # [B, S, Hd]

    # v-projection: VPU multiply + lane reduction (no N=1 MXU matmul)
    scores = jnp.sum(energy * v_ref[...][None, :, :], axis=-1)                  # [B, S]

    # mask consumed directly in [B, S]; robust comparison (no exact == on floats)
    scores = jnp.where(mask_ref[...] < 0.5, jnp.float32(-1e10), scores)
    scores = scores - jnp.max(scores, axis=1, keepdims=True)
    exps = jnp.exp(scores)
    a_bs = exps / jnp.sum(exps, axis=1, keepdims=True)                          # [B, S] softmax

    # ---------------- weighted context: sum_s a[b,s] * enc[b,s,:] -------------
    # TODO(synk): at realistic S/He2 run this as per-b [1,S]@[S,He2] on the MXU.
    weighted = jnp.sum(a_bs[:, :, None] * enc, axis=1)                          # [B, He2]

    # ---------------- single-step GRU cell (split input weights) --------------
    gi = (jnp.dot(emb, w_ie_ref[...], preferred_element_type=jnp.float32)
          + jnp.dot(weighted, w_iw_ref[...], preferred_element_type=jnp.float32)
          + b_ih_ref[...])                                                      # [B, 3Hd]
    gh = jnp.dot(hid, w_hh_ref[...],
                 preferred_element_type=jnp.float32) + b_hh_ref[...]            # [B, 3Hd]
    r = jax.nn.sigmoid(gi[:, 0:Hd] + gh[:, 0:Hd])
    z = jax.nn.sigmoid(gi[:, Hd:2 * Hd] + gh[:, Hd:2 * Hd])
    n = jnp.tanh(gi[:, 2 * Hd:3 * Hd] + r * gh[:, 2 * Hd:3 * Hd])
    h_new = (1.0 - z) * n + z * hid                                             # [B, Hd]

    # ---------------- fc_out as sum of partial matmuls (no lane concat) -------
    pred = (jnp.dot(h_new, w_oh_ref[...], preferred_element_type=jnp.float32)
            + jnp.dot(weighted, w_ow_ref[...], preferred_element_type=jnp.float32)
            + jnp.dot(emb, w_oe_ref[...], preferred_element_type=jnp.float32)
            + b_out_ref[...])                                                   # [B, V]

    # carry + per-step outputs
    h_scratch[...] = h_new
    pred_ref[...] = pred
    hid_out_ref[...] = h_new
    a_ref[...] = a_bs


# ------------------------------ wrapper ---------------------------------------
def split_params(params):
    """One-time re-factoring of the PyTorch-shaped weights (no per-step cost)."""
    Hd = params["w_hh"].shape[0]
    He2 = params["w_attn"].shape[0] - Hd
    E = params["emb_table"].shape[1]
    V = params["emb_table"].shape[0]
    return {
        # [V, 1, E]: each row is its own (1,E) tile -> cheap dynamic row gather
        "emb_table3": params["emb_table"].reshape(V, 1, E),
        # attention Linear([h; enc] -> Hd) split by input block
        "w_attn_h": params["w_attn"][:Hd],
        "w_attn_e": params["w_attn"][Hd:],
        "b_attn": params["b_attn"],
        "v_row": params["v"].reshape(1, -1),          # [1, Hd]
        # GRU input weights split by [emb | weighted]
        "w_ih_e": params["w_ih"][:E],
        "w_ih_w": params["w_ih"][E:],
        "b_ih": params["b_ih"],
        "w_hh": params["w_hh"],
        "b_hh": params["b_hh"],
        # fc_out split by [h_new | weighted | emb]
        "w_out_h": params["w_out"][:Hd],
        "w_out_w": params["w_out"][Hd:Hd + He2],
        "w_out_e": params["w_out"][Hd + He2:],
        "b_out": params["b_out"],
    }


def _resident_spec(shape):
    """Full-array block with a constant index_map -> loaded once, stays in VMEM."""
    zeros = (0,) * len(shape)
    return pl.BlockSpec(shape, lambda t, ids, _z=zeros: _z)


def decoder_decode(step_ids, hidden0, encoder_outputs, mask, sp):
    """Fused multi-step decode (teacher forcing): Decoder.forward applied T times.

    step_ids:         [T, B]       int32 token ids per decode step
    hidden0:          [B, Hd]      float32 initial decoder hidden
    encoder_outputs:  [S, B, He2]  float32 (PyTorch layout)
    mask:             [B, S]       float32 (1.0 keep / 0.0 pad)
    returns: predictions [T,B,V], hiddens [T,B,Hd], attentions [T,B,S]
    """
    T, B = step_ids.shape
    S = encoder_outputs.shape[0]
    He2 = encoder_outputs.shape[2]
    Hd = hidden0.shape[1]
    V, _, E = sp["emb_table3"].shape

    # one permute per source sequence, amortized over all T decode steps
    enc_bsh = jnp.transpose(encoder_outputs, (1, 0, 2))            # [B, S, He2]
    ids2d = step_ids.astype(jnp.int32)                             # SMEM scalar prefetch

    in_arrays = (hidden0, enc_bsh, mask, sp["emb_table3"],
                 sp["w_attn_h"], sp["w_attn_e"], sp["b_attn"], sp["v_row"],
                 sp["w_ih_e"], sp["w_ih_w"], sp["b_ih"], sp["w_hh"], sp["b_hh"],
                 sp["w_out_h"], sp["w_out_w"], sp["w_out_e"], sp["b_out"])
    in_specs = [_resident_spec(a.shape) for a in in_arrays]

    out_shapes = (
        jax.ShapeDtypeStruct((T, B, V), jnp.float32),    # predictions
        jax.ShapeDtypeStruct((T, B, Hd), jnp.float32),   # hidden per step
        jax.ShapeDtypeStruct((T, B, S), jnp.float32),    # attention per step
    )
    out_specs = (
        pl.BlockSpec((None, B, V), lambda t, ids: (t, 0, 0)),
        pl.BlockSpec((None, B, Hd), lambda t, ids: (t, 0, 0)),
        pl.BlockSpec((None, B, S), lambda t, ids: (t, 0, 0)),
    )

    grid_spec = pltpu.PrefetchScalarGridSpec(
        num_scalar_prefetch=1,
        grid=(T,),
        in_specs=in_specs,
        out_specs=out_specs,
        scratch_shapes=[pltpu.VMEM((B, Hd), jnp.float32),   # hidden-state carry
                        pltpu.VMEM((B, E), jnp.float32)],   # embedding gather buffer
    )

    # advisory cost estimate so XLA schedules around the fused kernel
    flops_step = 2 * B * (Hd * Hd + S * He2 * Hd + S * Hd + S * He2
                          + E * 3 * Hd + He2 * 3 * Hd + Hd * 3 * Hd
                          + (Hd + He2 + E) * V)
    trans_step = B * (S * Hd + S + 3 * Hd)
    bytes_in = sum(int(a.size) * 4 for a in in_arrays) + int(ids2d.size) * 4
    bytes_out = 4 * T * B * (V + Hd + S)
    cost = pl.CostEstimate(flops=T * flops_step,
                           transcendentals=T * trans_step,
                           bytes_accessed=bytes_in + bytes_out)

    preds, hids, attns = pl.pallas_call(
        decoder_step_kernel,
        out_shape=out_shapes,
        grid_spec=grid_spec,
        compiler_params=pltpu.CompilerParams(
            dimension_semantics=("arbitrary",),      # recurrent carry along T
            vmem_limit_bytes=32 << 20),
        cost_estimate=cost,
    )(ids2d, *in_arrays)
    return preds, hids, attns


def decoder_forward(input_ids, hidden, encoder_outputs, mask, sp):
    """Single-step mirror of Decoder.forward (T = 1)."""
    preds, hids, attns = decoder_decode(input_ids.reshape(1, -1), hidden,
                                        encoder_outputs, mask, sp)
    return preds[0], hids[0], attns[0]


# --------------------------- pure-JAX reference --------------------------------
def decoder_reference(input_ids, hidden, encoder_outputs, mask, params):
    embedded = jnp.take(params["emb_table"], input_ids, axis=0)
    enc = jnp.transpose(encoder_outputs, (1, 0, 2))
    B, S, He2 = enc.shape
    Hd = hidden.shape[1]
    hid_rep = jnp.broadcast_to(hidden[:, None, :], (B, S, Hd))
    energy = jnp.tanh(jnp.concatenate([hid_rep, enc], -1).reshape(B * S, -1)
                      @ params["w_attn"] + params["b_attn"])
    scores = (energy @ params["v"]).reshape(B, S)
    scores = jnp.where(mask == 0.0, -1e10, scores)
    a = jax.nn.softmax(scores, axis=1)
    weighted = jnp.einsum("bs,bsh->bh", a, enc)
    x = jnp.concatenate([embedded, weighted], axis=1)
    gi = x @ params["w_ih"] + params["b_ih"]
    gh = hidden @ params["w_hh"] + params["b_hh"]
    r = jax.nn.sigmoid(gi[:, :Hd] + gh[:, :Hd])
    z = jax.nn.sigmoid(gi[:, Hd:2 * Hd] + gh[:, Hd:2 * Hd])
    n = jnp.tanh(gi[:, 2 * Hd:] + r * gh[:, 2 * Hd:])
    h_new = (1.0 - z) * n + z * hidden
    pred = (jnp.concatenate([h_new, weighted, embedded], 1) @ params["w_out"]
            + params["b_out"])
    return pred, h_new, a


def reference_decode(step_ids, hidden, encoder_outputs, mask, params):
    preds, hids, attns = [], [], []
    h = hidden
    for t in range(step_ids.shape[0]):
        p, h, a = decoder_reference(step_ids[t], h, encoder_outputs, mask, params)
        preds.append(p); hids.append(h); attns.append(a)
    return jnp.stack(preds), jnp.stack(hids), jnp.stack(attns)


# ------------------------------- main -------------------------------------------
if __name__ == "__main__":
    OUTPUT_DIM = 32   # vocab size
    EMB_DIM = 16
    ENC_HID = 16      # encoder_outputs feature = 2 * ENC_HID = 32
    DEC_HID = 32
    BATCH = 4
    SRC_LEN = 8
    T_STEPS = 3
    HE2 = 2 * ENC_HID

    key = jax.random.PRNGKey(0)
    ks = jax.random.split(key, 16)
    sc = 0.1
    params = {
        "emb_table": sc * jax.random.normal(ks[0], (OUTPUT_DIM, EMB_DIM), jnp.float32),
        "w_attn": sc * jax.random.normal(ks[1], (DEC_HID + HE2, DEC_HID), jnp.float32),
        "b_attn": sc * jax.random.normal(ks[2], (1, DEC_HID), jnp.float32),
        "v":      sc * jax.random.normal(ks[3], (DEC_HID, 1), jnp.float32),
        "w_ih": sc * jax.random.normal(ks[4], (HE2 + EMB_DIM, 3 * DEC_HID), jnp.float32),
        "b_ih": sc * jax.random.normal(ks[5], (1, 3 * DEC_HID), jnp.float32),
        "w_hh": sc * jax.random.normal(ks[6], (DEC_HID, 3 * DEC_HID), jnp.float32),
        "b_hh": sc * jax.random.normal(ks[7], (1, 3 * DEC_HID), jnp.float32),
        "w_out": sc * jax.random.normal(ks[8], (HE2 + DEC_HID + EMB_DIM, OUTPUT_DIM), jnp.float32),
        "b_out": sc * jax.random.normal(ks[9], (1, OUTPUT_DIM), jnp.float32),
    }

    step_ids = jax.random.randint(ks[10], (T_STEPS, BATCH), 0, OUTPUT_DIM, jnp.int32)
    hidden = jax.random.normal(ks[11], (BATCH, DEC_HID), jnp.float32)
    encoder_outputs = jax.random.normal(ks[12], (SRC_LEN, BATCH, HE2), jnp.float32)
    lengths = jnp.array([SRC_LEN, SRC_LEN - 2, SRC_LEN - 3, SRC_LEN - 5], jnp.int32)
    mask = (jnp.arange(SRC_LEN)[None, :] < lengths[:, None]).astype(jnp.float32)

    sp = split_params(params)   # one-time weight re-factoring (not per decode step)

    # fused multi-step decode: one pallas_call, weights resident across T steps
    decode = jax.jit(functools.partial(decoder_decode, sp=sp))
    preds, hids, attns = decode(step_ids, hidden, encoder_outputs, mask)
    jax.block_until_ready((preds, hids, attns))

    preds_r, hids_r, attns_r = reference_decode(step_ids, hidden, encoder_outputs,
                                                mask, params)
    assert jnp.allclose(preds, preds_r, rtol=2e-3, atol=2e-3)
    assert jnp.allclose(hids, hids_r, rtol=2e-3, atol=2e-3)
    assert jnp.allclose(attns, attns_r, rtol=2e-3, atol=2e-3)
    assert preds.shape == (T_STEPS, BATCH, OUTPUT_DIM)
    assert hids.shape == (T_STEPS, BATCH, DEC_HID)
    assert attns.shape == (T_STEPS, BATCH, SRC_LEN)

    # single-step path (exact Decoder.forward semantics)
    fwd = jax.jit(functools.partial(decoder_forward, sp=sp))
    p1, h1, a1 = fwd(step_ids[0], hidden, encoder_outputs, mask)
    jax.block_until_ready((p1, h1, a1))
    p1_r, h1_r, a1_r = decoder_reference(step_ids[0], hidden, encoder_outputs, mask, params)
    assert jnp.allclose(p1, p1_r, rtol=2e-3, atol=2e-3)
    assert jnp.allclose(h1, h1_r, rtol=2e-3, atol=2e-3)
    assert jnp.allclose(a1, a1_r, rtol=2e-3, atol=2e-3)

    print("KERNEL_OK")
</pallas_src>

<mosaic_0001>
module attributes {stable_mosaic.version = 11 : i64} {
  func.func @decoder_step_kernel(%arg0: i32, %arg1: memref<3x4xi32, #tpu.memory_space<smem>>, %arg2: memref<4x32xf32, #tpu.memory_space<vmem>>, %arg3: memref<4x8x32xf32, #tpu.memory_space<vmem>>, %arg4: memref<4x8xf32, #tpu.memory_space<vmem>>, %arg5: memref<32x1x16xf32, #tpu.memory_space<vmem>>, %arg6: memref<32x32xf32, #tpu.memory_space<vmem>>, %arg7: memref<32x32xf32, #tpu.memory_space<vmem>>, %arg8: memref<1x32xf32, #tpu.memory_space<vmem>>, %arg9: memref<1x32xf32, #tpu.memory_space<vmem>>, %arg10: memref<16x96xf32, #tpu.memory_space<vmem>>, %arg11: memref<32x96xf32, #tpu.memory_space<vmem>>, %arg12: memref<1x96xf32, #tpu.memory_space<vmem>>, %arg13: memref<32x96xf32, #tpu.memory_space<vmem>>, %arg14: memref<1x96xf32, #tpu.memory_space<vmem>>, %arg15: memref<32x32xf32, #tpu.memory_space<vmem>>, %arg16: memref<32x32xf32, #tpu.memory_space<vmem>>, %arg17: memref<16x32xf32, #tpu.memory_space<vmem>>, %arg18: memref<1x32xf32, #tpu.memory_space<vmem>>, %arg19: memref<1x4x32xf32, #tpu.memory_space<vmem>>, %arg20: memref<1x4x32xf32, #tpu.memory_space<vmem>>, %arg21: memref<1x4x8xf32, #tpu.memory_space<vmem>>, %arg22: memref<4x32xf32, #tpu.memory_space<vmem>>, %arg23: memref<4x16xf32, #tpu.memory_space<vmem>>) attributes {dimension_semantics = [#tpu.dimension_semantics<arbitrary>], iteration_bounds = array<i64: 3>, scalar_prefetch = 1 : i64, scratch_operands = 2 : i64, tpu.core_type = #tpu.core_type<tc>, window_params = [{pipeline_mode = #tpu.pipeline_mode<synchronous>, transform_indices = @transform_0, window_bounds = array<i64: 4, 32>}, {pipeline_mode = #tpu.pipeline_mode<synchronous>, transform_indices = @transform_1, window_bounds = array<i64: 4, 8, 32>}, {pipeline_mode = #tpu.pipeline_mode<synchronous>, transform_indices = @transform_2, window_bounds = array<i64: 4, 8>}, {pipeline_mode = #tpu.pipeline_mode<synchronous>, transform_indices = @transform_3, window_bounds = array<i64: 32, 1, 16>}, {pipeline_mode = #tpu.pipeline_mode<synchronous>, transform_indices = @transform_4, window_bounds = array<i64: 32, 32>}, {pipeline_mode = #tpu.pipeline_mode<synchronous>, transform_indices = @transform_5, window_bounds = array<i64: 32, 32>}, {pipeline_mode = #tpu.pipeline_mode<synchronous>, transform_indices = @transform_6, window_bounds = array<i64: 1, 32>}, {pipeline_mode = #tpu.pipeline_mode<synchronous>, transform_indices = @transform_7, window_bounds = array<i64: 1, 32>}, {pipeline_mode = #tpu.pipeline_mode<synchronous>, transform_indices = @transform_8, window_bounds = array<i64: 16, 96>}, {pipeline_mode = #tpu.pipeline_mode<synchronous>, transform_indices = @transform_9, window_bounds = array<i64: 32, 96>}, {pipeline_mode = #tpu.pipeline_mode<synchronous>, transform_indices = @transform_10, window_bounds = array<i64: 1, 96>}, {pipeline_mode = #tpu.pipeline_mode<synchronous>, transform_indices = @transform_11, window_bounds = array<i64: 32, 96>}, {pipeline_mode = #tpu.pipeline_mode<synchronous>, transform_indices = @transform_12, window_bounds = array<i64: 1, 96>}, {pipeline_mode = #tpu.pipeline_mode<synchronous>, transform_indices = @transform_13, window_bounds = array<i64: 32, 32>}, {pipeline_mode = #tpu.pipeline_mode<synchronous>, transform_indices = @transform_14, window_bounds = array<i64: 32, 32>}, {pipeline_mode = #tpu.pipeline_mode<synchronous>, transform_indices = @transform_15, window_bounds = array<i64: 16, 32>}, {pipeline_mode = #tpu.pipeline_mode<synchronous>, transform_indices = @transform_16, window_bounds = array<i64: 1, 32>}, {transform_indices = @transform_17, window_bounds = array<i64: 1, 4, 32>}, {transform_indices = @transform_18, window_bounds = array<i64: 1, 4, 32>}, {transform_indices = @transform_19, window_bounds = array<i64: 1, 4, 8>}]} {
    %c0_i32 = arith.constant 0 : i32
    %0 = arith.cmpi eq, %arg0, %c0_i32 : i32
    %1 = arith.extui %0 : i1 to i32
    %c0_i32_0 = arith.constant 0 : i32
    %2 = arith.cmpi ne, %1, %c0_i32_0 : i32
    scf.if %2 {
      %c0_79 = arith.constant 0 : index
      %c0_80 = arith.constant 0 : index
      %126 = vector.load %arg2[%c0_79, %c0_80] : memref<4x32xf32, #tpu.memory_space<vmem>>, vector<4x32xf32>
      %c0_81 = arith.constant 0 : index
      %c0_82 = arith.constant 0 : index
      %127 = vector.load %arg22[%c0_81, %c0_82] : memref<4x32xf32, #tpu.memory_space<vmem>>, vector<4x32xf32>
      tpu.vector_store %arg22[%c0_81, %c0_82], %126 {strides = array<i32>} : memref<4x32xf32, #tpu.memory_space<vmem>>, vector<4x32xf32>,
    } else {
    }
    %c0 = arith.constant 0 : index
    %c0_1 = arith.constant 0 : index
    %c0_2 = arith.constant 0 : index
    %3 = vector.load %arg3[%c0, %c0_1, %c0_2] : memref<4x8x32xf32, #tpu.memory_space<vmem>>, vector<4x8x32xf32>
    %c0_3 = arith.constant 0 : index
    %c0_4 = arith.constant 0 : index
    %4 = vector.load %arg22[%c0_3, %c0_4] : memref<4x32xf32, #tpu.memory_space<vmem>>, vector<4x32xf32>
    %5 = arith.index_cast %arg0 : i32 to index
    %c0_5 = arith.constant 0 : index
    %6 = memref.load %arg1[%5, %c0_5] : memref<3x4xi32, #tpu.memory_space<smem>>
    %7 = arith.index_cast %6 : i32 to index
    %c0_6 = arith.constant 0 : index
    %c0_7 = arith.constant 0 : index
    %8 = vector.load %arg5[%7, %c0_6, %c0_7] : memref<32x1x16xf32, #tpu.memory_space<vmem>>, vector<1x1x16xf32>
    %9 = vector.shape_cast %8 : vector<1x1x16xf32> to vector<1x16xf32>
    %c0_8 = arith.constant 0 : index
    %c0_9 = arith.constant 0 : index
    %10 = vector.load %arg23[%c0_8, %c0_9] : memref<4x16xf32, #tpu.memory_space<vmem>>, vector<1x16xf32>
    tpu.vector_store %arg23[%c0_8, %c0_9], %9 {strides = array<i32>} : memref<4x16xf32, #tpu.memory_space<vmem>>, vector<1x16xf32>,
    %11 = arith.index_cast %arg0 : i32 to index
    %c1 = arith.constant 1 : index
    %12 = memref.load %arg1[%11, %c1] : memref<3x4xi32, #tpu.memory_space<smem>>
    %13 = arith.index_cast %12 : i32 to index
    %c0_10 = arith.constant 0 : index
    %c0_11 = arith.constant 0 : index
    %14 = vector.load %arg5[%13, %c0_10, %c0_11] : memref<32x1x16xf32, #tpu.memory_space<vmem>>, vector<1x1x16xf32>
    %15 = vector.shape_cast %14 : vector<1x1x16xf32> to vector<1x16xf32>
    %c1_12 = arith.constant 1 : index
    %c0_13 = arith.constant 0 : index
    %16 = vector.load %arg23[%c1_12, %c0_13] : memref<4x16xf32, #tpu.memory_space<vmem>>, vector<1x16xf32>
    tpu.vector_store %arg23[%c1_12, %c0_13], %15 {strides = array<i32>} : memref<4x16xf32, #tpu.memory_space<vmem>>, vector<1x16xf32>,
    %17 = arith.index_cast %arg0 : i32 to index
    %c2 = arith.constant 2 : index
    %18 = memref.load %arg1[%17, %c2] : memref<3x4xi32, #tpu.memory_space<smem>>
    %19 = arith.index_cast %18 : i32 to index
    %c0_14 = arith.constant 0 : index
    %c0_15 = arith.constant 0 : index
    %20 = vector.load %arg5[%19, %c0_14, %c0_15] : memref<32x1x16xf32, #tpu.memory_space<vmem>>, vector<1x1x16xf32>
    %21 = vector.shape_cast %20 : vector<1x1x16xf32> to vector<1x16xf32>
    %c2_16 = arith.constant 2 : index
    %c0_17 = arith.constant 0 : index
    %22 = vector.load %arg23[%c2_16, %c0_17] : memref<4x16xf32, #tpu.memory_space<vmem>>, vector<1x16xf32>
    tpu.vector_store %arg23[%c2_16, %c0_17], %21 {strides = array<i32>} : memref<4x16xf32, #tpu.memory_space<vmem>>, vector<1x16xf32>,
    %23 = arith.index_cast %arg0 : i32 to index
    %c3 = arith.constant 3 : index
    %24 = memref.load %arg1[%23, %c3] : memref<3x4xi32, #tpu.memory_space<smem>>
    %25 = arith.index_cast %24 : i32 to index
    %c0_18 = arith.constant 0 : index
    %c0_19 = arith.constant 0 : index
    %26 = vector.load %arg5[%25, %c0_18, %c0_19] : memref<32x1x16xf32, #tpu.memory_space<vmem>>, vector<1x1x16xf32>
    %27 = vector.shape_cast %26 : vector<1x1x16xf32> to vector<1x16xf32>
    %c3_20 = arith.constant 3 : index
    %c0_21 = arith.constant 0 : index
    %28 = vector.load %arg23[%c3_20, %c0_21] : memref<4x16xf32, #tpu.memory_space<vmem>>, vector<1x16xf32>
    tpu.vector_store %arg23[%c3_20, %c0_21], %27 {strides = array<i32>} : memref<4x16xf32, #tpu.memory_space<vmem>>, vector<1x16xf32>,
    %c0_22 = arith.constant 0 : index
    %c0_23 = arith.constant 0 : index
    %29 = vector.load %arg23[%c0_22, %c0_23] : memref<4x16xf32, #tpu.memory_space<vmem>>, vector<4x16xf32>
    %c0_24 = arith.constant 0 : index
    %c0_25 = arith.constant 0 : index
    %30 = vector.load %arg6[%c0_24, %c0_25] : memref<32x32xf32, #tpu.memory_space<vmem>>, vector<32x32xf32>
    %cst = arith.constant dense<0.000000e+00> : vector<4x32xf32>
    %31 = tpu.matmul %4, %30, %cst {dimension_numbers = #tpu.dot_dimension_numbers<[1], [0], [0], [1], [0, 0, 1, 1], [], []>} : vector<4x32xf32>, vector<32x32xf32>, vector<4x32xf32> -> vector<4x32xf32>
    %c0_26 = arith.constant 0 : index
    %c0_27 = arith.constant 0 : index
    %32 = vector.load %arg8[%c0_26, %c0_27] : memref<1x32xf32, #tpu.memory_space<vmem>>, vector<1x32xf32>
    %33 = vector.broadcast %32 : vector<1x32xf32> to vector<4x32xf32>
    %34 = arith.addf %31, %33 : vector<4x32xf32>
    %35 = vector.shape_cast %3 : vector<4x8x32xf32> to vector<32x32xf32>
    %c0_28 = arith.constant 0 : index
    %c0_29 = arith.constant 0 : index
    %36 = vector.load %arg7[%c0_28, %c0_29] : memref<32x32xf32, #tpu.memory_space<vmem>>, vector<32x32xf32>
    %cst_30 = arith.constant dense<0.000000e+00> : vector<32x32xf32>
    %37 = tpu.matmul %35, %36, %cst_30 {dimension_numbers = #tpu.dot_dimension_numbers<[1], [0], [0], [1], [0, 0, 1, 1], [], []>} : vector<32x32xf32>, vector<32x32xf32>, vector<32x32xf32> -> vector<32x32xf32>
    %38 = vector.shape_cast %37 : vector<32x32xf32> to vector<4x8x32xf32>
    %39 = vector.shape_cast %34 : vector<4x32xf32> to vector<4x1x32xf32>
    %40 = vector.broadcast %39 : vector<4x1x32xf32> to vector<4x8x32xf32>
    %41 = arith.addf %38, %40 : vector<4x8x32xf32>
    %42 = math.tanh %41 : vector<4x8x32xf32>
    %c0_31 = arith.constant 0 : index
    %c0_32 = arith.constant 0 : index
    %43 = vector.load %arg9[%c0_31, %c0_32] : memref<1x32xf32, #tpu.memory_space<vmem>>, vector<1x32xf32>
    %44 = vector.shape_cast %43 : vector<1x32xf32> to vector<1x1x32xf32>
    %45 = vector.broadcast %44 : vector<1x1x32xf32> to vector<4x8x32xf32>
    %46 = arith.mulf %42, %45 : vector<4x8x32xf32>
    %cst_33 = arith.constant dense<0.000000e+00> : vector<4x8xf32>
    %47 = vector.multi_reduction <add>, %46, %cst_33 [2] : vector<4x8x32xf32> to vector<4x8xf32>
    %c0_34 = arith.constant 0 : index
    %c0_35 = arith.constant 0 : index
    %48 = vector.load %arg4[%c0_34, %c0_35] : memref<4x8xf32, #tpu.memory_space<vmem>>, vector<4x8xf32>
    %cst_36 = arith.constant 5.000000e-01 : f32
    %49 = vector.broadcast %cst_36 : f32 to vector<4x8xf32>
    %50 = arith.cmpf olt, %48, %49 : vector<4x8xf32>
    %cst_37 = arith.constant -1.000000e+10 : f32
    %51 = vector.broadcast %cst_37 : f32 to vector<4x8xf32>
    %52 = arith.select %50, %51, %47 : vector<4x8xi1>, vector<4x8xf32>
    %cst_38 = arith.constant dense<0xFF800000> : vector<4xf32>
    %53 = vector.multi_reduction <maximumf>, %52, %cst_38 [1] : vector<4x8xf32> to vector<4xf32>
    %54 = vector.shape_cast %53 : vector<4xf32> to vector<4x1xf32>
    %55 = vector.broadcast %54 : vector<4x1xf32> to vector<4x8xf32>
    %56 = arith.subf %52, %55 : vector<4x8xf32>
    %57 = math.exp %56 : vector<4x8xf32>
    %cst_39 = arith.constant dense<0.000000e+00> : vector<4xf32>
    %58 = vector.multi_reduction <add>, %57, %cst_39 [1] : vector<4x8xf32> to vector<4xf32>
    %59 = vector.shape_cast %58 : vector<4xf32> to vector<4x1xf32>
    %60 = vector.broadcast %59 : vector<4x1xf32> to vector<4x8xf32>
    %61 = arith.divf %57, %60 : vector<4x8xf32>
    %62 = vector.shape_cast %61 : vector<4x8xf32> to vector<4x8x1xf32>
    %63 = vector.broadcast %62 : vector<4x8x1xf32> to vector<4x8x32xf32>
    %64 = arith.mulf %63, %3 : vector<4x8x32xf32>
    %cst_40 = arith.constant dense<0.000000e+00> : vector<4x32xf32>
    %65 = vector.multi_reduction <add>, %64, %cst_40 [1] : vector<4x8x32xf32> to vector<4x32xf32>
    %c0_41 = arith.constant 0 : index
    %c0_42 = arith.constant 0 : index
    %66 = vector.load %arg10[%c0_41, %c0_42] : memref<16x96xf32, #tpu.memory_space<vmem>>, vector<16x96xf32>
    %cst_43 = arith.constant dense<0.000000e+00> : vector<4x96xf32>
    %67 = tpu.matmul %29, %66, %cst_43 {dimension_numbers = #tpu.dot_dimension_numbers<[1], [0], [0], [1], [0, 0, 1, 1], [], []>} : vector<4x16xf32>, vector<16x96xf32>, vector<4x96xf32> -> vector<4x96xf32>
    %c0_44 = arith.constant 0 : index
    %c0_45 = arith.constant 0 : index
    %68 = vector.load %arg11[%c0_44, %c0_45] : memref<32x96xf32, #tpu.memory_space<vmem>>, vector<32x96xf32>
    %cst_46 = arith.constant dense<0.000000e+00> : vector<4x96xf32>
    %69 = tpu.matmul %65, %68, %cst_46 {dimension_numbers = #tpu.dot_dimension_numbers<[1], [0], [0], [1], [0, 0, 1, 1], [], []>} : vector<4x32xf32>, vector<32x96xf32>, vector<4x96xf32> -> vector<4x96xf32>
    %70 = arith.addf %67, %69 : vector<4x96xf32>
    %c0_47 = arith.constant 0 : index
    %c0_48 = arith.constant 0 : index
    %71 = vector.load %arg12[%c0_47, %c0_48] : memref<1x96xf32, #tpu.memory_space<vmem>>, vector<1x96xf32>
    %72 = vector.broadcast %71 : vector<1x96xf32> to vector<4x96xf32>
    %73 = arith.addf %70, %72 : vector<4x96xf32>
    %c0_49 = arith.constant 0 : index
    %c0_50 = arith.constant 0 : index
    %74 = vector.load %arg13[%c0_49, %c0_50] : memref<32x96xf32, #tpu.memory_space<vmem>>, vector<32x96xf32>
    %cst_51 = arith.constant dense<0.000000e+00> : vector<4x96xf32>
    %75 = tpu.matmul %4, %74, %cst_51 {dimension_numbers = #tpu.dot_dimension_numbers<[1], [0], [0], [1], [0, 0, 1, 1], [], []>} : vector<4x32xf32>, vector<32x96xf32>, vector<4x96xf32> -> vector<4x96xf32>
    %c0_52 = arith.constant 0 : index
    %c0_53 = arith.constant 0 : index
    %76 = vector.load %arg14[%c0_52, %c0_53] : memref<1x96xf32, #tpu.memory_space<vmem>>, vector<1x96xf32>
    %77 = vector.broadcast %76 : vector<1x96xf32> to vector<4x96xf32>
    %78 = arith.addf %75, %77 : vector<4x96xf32>
    %79 = vector.extract_strided_slice %73 {offsets = [0, 0], sizes = [4, 32], strides = [1, 1]} : vector<4x96xf32> to vector<4x32xf32>
    %80 = vector.extract_strided_slice %78 {offsets = [0, 0], sizes = [4, 32], strides = [1, 1]} : vector<4x96xf32> to vector<4x32xf32>
    %81 = arith.addf %79, %80 : vector<4x32xf32>
    %82 = arith.negf %81 : vector<4x32xf32>
    %83 = math.exp %82 : vector<4x32xf32>
    %cst_54 = arith.constant 1.000000e+00 : f32
    %84 = vector.broadcast %cst_54 : f32 to vector<4x32xf32>
    %85 = arith.addf %84, %83 : vector<4x32xf32>
    %86 = arith.divf %84, %85 : vector<4x32xf32>
    %87 = vector.extract_strided_slice %73 {offsets = [0, 32], sizes = [4, 32], strides = [1, 1]} : vector<4x96xf32> to vector<4x32xf32>
    %88 = vector.extract_strided_slice %78 {offsets = [0, 32], sizes = [4, 32], strides = [1, 1]} : vector<4x96xf32> to vector<4x32xf32>
    %89 = arith.addf %87, %88 : vector<4x32xf32>
    %90 = arith.negf %89 : vector<4x32xf32>
    %91 = math.exp %90 : vector<4x32xf32>
    %cst_55 = arith.constant 1.000000e+00 : f32
    %92 = vector.broadcast %cst_55 : f32 to vector<4x32xf32>
    %93 = arith.addf %92, %91 : vector<4x32xf32>
    %94 = arith.divf %92, %93 : vector<4x32xf32>
    %95 = vector.extract_strided_slice %73 {offsets = [0, 64], sizes = [4, 32], strides = [1, 1]} : vector<4x96xf32> to vector<4x32xf32>
    %96 = vector.extract_strided_slice %78 {offsets = [0, 64], sizes = [4, 32], strides = [1, 1]} : vector<4x96xf32> to vector<4x32xf32>
    %97 = arith.mulf %86, %96 : vector<4x32xf32>
    %98 = arith.addf %95, %97 : vector<4x32xf32>
    %99 = math.tanh %98 : vector<4x32xf32>
    %cst_56 = arith.constant 1.000000e+00 : f32
    %100 = vector.broadcast %cst_56 : f32 to vector<4x32xf32>
    %101 = arith.subf %100, %94 : vector<4x32xf32>
    %102 = arith.mulf %101, %99 : vector<4x32xf32>
    %103 = arith.mulf %94, %4 : vector<4x32xf32>
    %104 = arith.addf %102, %103 : vector<4x32xf32>
    %c0_57 = arith.constant 0 : index
    %c0_58 = arith.constant 0 : index
    %105 = vector.load %arg15[%c0_57, %c0_58] : memref<32x32xf32, #tpu.memory_space<vmem>>, vector<32x32xf32>
    %cst_59 = arith.constant dense<0.000000e+00> : vector<4x32xf32>
    %106 = tpu.matmul %104, %105, %cst_59 {dimension_numbers = #tpu.dot_dimension_numbers<[1], [0], [0], [1], [0, 0, 1, 1], [], []>} : vector<4x32xf32>, vector<32x32xf32>, vector<4x32xf32> -> vector<4x32xf32>
    %c0_60 = arith.constant 0 : index
    %c0_61 = arith.constant 0 : index
    %107 = vector.load %arg16[%c0_60, %c0_61] : memref<32x32xf32, #tpu.memory_space<vmem>>, vector<32x32xf32>
    %cst_62 = arith.constant dense<0.000000e+00> : vector<4x32xf32>
    %108 = tpu.matmul %65, %107, %cst_62 {dimension_numbers = #tpu.dot_dimension_numbers<[1], [0], [0], [1], [0, 0, 1, 1], [], []>} : vector<4x32xf32>, vector<32x32xf32>, vector<4x32xf32> -> vector<4x32xf32>
    %109 = arith.addf %106, %108 : vector<4x32xf32>
    %c0_63 = arith.constant 0 : index
    %c0_64 = arith.constant 0 : index
    %110 = vector.load %arg17[%c0_63, %c0_64] : memref<16x32xf32, #tpu.memory_space<vmem>>, vector<16x32xf32>
    %cst_65 = arith.constant dense<0.000000e+00> : vector<4x32xf32>
    %111 = tpu.matmul %29, %110, %cst_65 {dimension_numbers = #tpu.dot_dimension_numbers<[1], [0], [0], [1], [0, 0, 1, 1], [], []>} : vector<4x16xf32>, vector<16x32xf32>, vector<4x32xf32> -> vector<4x32xf32>
    %112 = arith.addf %109, %111 : vector<4x32xf32>
    %c0_66 = arith.constant 0 : index
    %c0_67 = arith.constant 0 : index
    %113 = vector.load %arg18[%c0_66, %c0_67] : memref<1x32xf32, #tpu.memory_space<vmem>>, vector<1x32xf32>
    %114 = vector.broadcast %113 : vector<1x32xf32> to vector<4x32xf32>
    %115 = arith.addf %112, %114 : vector<4x32xf32>
    %c0_68 = arith.constant 0 : index
    %c0_69 = arith.constant 0 : index
    %116 = vector.load %arg22[%c0_68, %c0_69] : memref<4x32xf32, #tpu.memory_space<vmem>>, vector<4x32xf32>
    tpu.vector_store %arg22[%c0_68, %c0_69], %104 {strides = array<i32>} : memref<4x32xf32, #tpu.memory_space<vmem>>, vector<4x32xf32>,
    %c0_70 = arith.constant 0 : index
    %c0_71 = arith.constant 0 : index
    %c0_72 = arith.constant 0 : index
    %117 = vector.load %arg19[%c0_70, %c0_71, %c0_72] : memref<1x4x32xf32, #tpu.memory_space<vmem>>, vector<1x4x32xf32>
    %118 = vector.shape_cast %117 : vector<1x4x32xf32> to vector<4x32xf32>
    %119 = vector.shape_cast %115 : vector<4x32xf32> to vector<1x4x32xf32>
    tpu.vector_store %arg19[%c0_70, %c0_71, %c0_72], %119 {strides = array<i32>} : memref<1x4x32xf32, #tpu.memory_space<vmem>>, vector<1x4x32xf32>,
    %c0_73 = arith.constant 0 : index
    %c0_74 = arith.constant 0 : index
    %c0_75 = arith.constant 0 : index
    %120 = vector.load %arg20[%c0_73, %c0_74, %c0_75] : memref<1x4x32xf32, #tpu.memory_space<vmem>>, vector<1x4x32xf32>
    %121 = vector.shape_cast %120 : vector<1x4x32xf32> to vector<4x32xf32>
    %122 = vector.shape_cast %104 : vector<4x32xf32> to vector<1x4x32xf32>
    tpu.vector_store %arg20[%c0_73, %c0_74, %c0_75], %122 {strides = array<i32>} : memref<1x4x32xf32, #tpu.memory_space<vmem>>, vector<1x4x32xf32>,
    %c0_76 = arith.constant 0 : index
    %c0_77 = arith.constant 0 : index
    %c0_78 = arith.constant 0 : index
    %123 = vector.load %arg21[%c0_76, %c0_77, %c0_78] : memref<1x4x8xf32, #tpu.memory_space<vmem>>, vector<1x4x8xf32>
    %124 = vector.shape_cast %123 : vector<1x4x8xf32> to vector<4x8xf32>
    %125 = vector.shape_cast %61 : vector<4x8xf32> to vector<1x4x8xf32>
    tpu.vector_store %arg21[%c0_76, %c0_77, %c0_78], %125 {strides = array<i32>} : memref<1x4x8xf32, #tpu.memory_space<vmem>>, vector<1x4x8xf32>,
    return
  }
  func.func @transform_0(%arg0: i32, %arg1: memref<3x4xi32, #tpu.memory_space<smem>>) -> (i32, i32) {
    %c0_i32 = arith.constant 0 : i32
    %c0_i32_0 = arith.constant 0 : i32
    %c0_i32_1 = arith.constant 0 : i32
    return %c0_i32, %c0_i32_0 : i32, i32
  }
  func.func @transform_1(%arg0: i32, %arg1: memref<3x4xi32, #tpu.memory_space<smem>>) -> (i32, i32, i32) {
    %c0_i32 = arith.constant 0 : i32
    %c0_i32_0 = arith.constant 0 : i32
    %c0_i32_1 = arith.constant 0 : i32
    %c0_i32_2 = arith.constant 0 : i32
    return %c0_i32, %c0_i32_0, %c0_i32_1 : i32, i32, i32
  }
  func.func @transform_2(%arg0: i32, %arg1: memref<3x4xi32, #tpu.memory_space<smem>>) -> (i32, i32) {
    %c0_i32 = arith.constant 0 : i32
    %c0_i32_0 = arith.constant 0 : i32
    %c0_i32_1 = arith.constant 0 : i32
    return %c0_i32, %c0_i32_0 : i32, i32
  }
  func.func @transform_3(%arg0: i32, %arg1: memref<3x4xi32, #tpu.memory_space<smem>>) -> (i32, i32, i32) {
    %c0_i32 = arith.constant 0 : i32
    %c0_i32_0 = arith.constant 0 : i32
    %c0_i32_1 = arith.constant 0 : i32
    %c0_i32_2 = arith.constant 0 : i32
    return %c0_i32, %c0_i32_0, %c0_i32_1 : i32, i32, i32
  }
  func.func @transform_4(%arg0: i32, %arg1: memref<3x4xi32, #tpu.memory_space<smem>>) -> (i32, i32) {
    %c0_i32 = arith.constant 0 : i32
    %c0_i32_0 = arith.constant 0 : i32
    %c0_i32_1 = arith.constant 0 : i32
    return %c0_i32, %c0_i32_0 : i32, i32
  }
  func.func @transform_5(%arg0: i32, %arg1: memref<3x4xi32, #tpu.memory_space<smem>>) -> (i32, i32) {
    %c0_i32 = arith.constant 0 : i32
    %c0_i32_0 = arith.constant 0 : i32
    %c0_i32_1 = arith.constant 0 : i32
    return %c0_i32, %c0_i32_0 : i32, i32
  }
  func.func @transform_6(%arg0: i32, %arg1: memref<3x4xi32, #tpu.memory_space<smem>>) -> (i32, i32) {
    %c0_i32 = arith.constant 0 : i32
    %c0_i32_0 = arith.constant 0 : i32
    %c0_i32_1 = arith.constant 0 : i32
    return %c0_i32, %c0_i32_0 : i32, i32
  }
  func.func @transform_7(%arg0: i32, %arg1: memref<3x4xi32, #tpu.memory_space<smem>>) -> (i32, i32) {
    %c0_i32 = arith.constant 0 : i32
    %c0_i32_0 = arith.constant 0 : i32
    %c0_i32_1 = arith.constant 0 : i32
    return %c0_i32, %c0_i32_0 : i32, i32
  }
  func.func @transform_8(%arg0: i32, %arg1: memref<3x4xi32, #tpu.memory_space<smem>>) -> (i32, i32) {
    %c0_i32 = arith.constant 0 : i32
    %c0_i32_0 = arith.constant 0 : i32
    %c0_i32_1 = arith.constant 0 : i32
    return %c0_i32, %c0_i32_0 : i32, i32
  }
  func.func @transform_9(%arg0: i32, %arg1: memref<3x4xi32, #tpu.memory_space<smem>>) -> (i32, i32) {
    %c0_i32 = arith.constant 0 : i32
    %c0_i32_0 = arith.constant 0 : i32
    %c0_i32_1 = arith.constant 0 : i32
    return %c0_i32, %c0_i32_0 : i32, i32
  }
  func.func @transform_10(%arg0: i32, %arg1: memref<3x4xi32, #tpu.memory_space<smem>>) -> (i32, i32) {
    %c0_i32 = arith.constant 0 : i32
    %c0_i32_0 = arith.constant 0 : i32
    %c0_i32_1 = arith.constant 0 : i32
    return %c0_i32, %c0_i32_0 : i32, i32
  }
  func.func @transform_11(%arg0: i32, %arg1: memref<3x4xi32, #tpu.memory_space<smem>>) -> (i32, i32) {
    %c0_i32 = arith.constant 0 : i32
    %c0_i32_0 = arith.constant 0 : i32
    %c0_i32_1 = arith.constant 0 : i32
    return %c0_i32, %c0_i32_0 : i32, i32
  }
  func.func @transform_12(%arg0: i32, %arg1: memref<3x4xi32, #tpu.memory_space<smem>>) -> (i32, i32) {
    %c0_i32 = arith.constant 0 : i32
    %c0_i32_0 = arith.constant 0 : i32
    %c0_i32_1 = arith.constant 0 : i32
    return %c0_i32, %c0_i32_0 : i32, i32
  }
  func.func @transform_13(%arg0: i32, %arg1: memref<3x4xi32, #tpu.memory_space<smem>>) -> (i32, i32) {
    %c0_i32 = arith.constant 0 : i32
    %c0_i32_0 = arith.constant 0 : i32
    %c0_i32_1 = arith.constant 0 : i32
    return %c0_i32, %c0_i32_0 : i32, i32
  }
  func.func @transform_14(%arg0: i32, %arg1: memref<3x4xi32, #tpu.memory_space<smem>>) -> (i32, i32) {
    %c0_i32 = arith.constant 0 : i32
    %c0_i32_0 = arith.constant 0 : i32
    %c0_i32_1 = arith.constant 0 : i32
    return %c0_i32, %c0_i32_0 : i32, i32
  }
  func.func @transform_15(%arg0: i32, %arg1: memref<3x4xi32, #tpu.memory_space<smem>>) -> (i32, i32) {
    %c0_i32 = arith.constant 0 : i32
    %c0_i32_0 = arith.constant 0 : i32
    %c0_i32_1 = arith.constant 0 : i32
    return %c0_i32, %c0_i32_0 : i32, i32
  }
  func.func @transform_16(%arg0: i32, %arg1: memref<3x4xi32, #tpu.memory_space<smem>>) -> (i32, i32) {
    %c0_i32 = arith.constant 0 : i32
    %c0_i32_0 = arith.constant 0 : i32
    %c0_i32_1 = arith.constant 0 : i32
    return %c0_i32, %c0_i32_0 : i32, i32
  }
  func.func @transform_17(%arg0: i32, %arg1: memref<3x4xi32, #tpu.memory_space<smem>>) -> (i32, i32, i32) {
    %c0_i32 = arith.constant 0 : i32
    %c0_i32_0 = arith.constant 0 : i32
    %c0_i32_1 = arith.constant 0 : i32
    return %arg0, %c0_i32, %c0_i32_0 : i32, i32, i32
  }
  func.func @transform_18(%arg0: i32, %arg1: memref<3x4xi32, #tpu.memory_space<smem>>) -> (i32, i32, i32) {
    %c0_i32 = arith.constant 0 : i32
    %c0_i32_0 = arith.constant 0 : i32
    %c0_i32_1 = arith.constant 0 : i32
    return %arg0, %c0_i32, %c0_i32_0 : i32, i32, i32
  }
  func.func @transform_19(%arg0: i32, %arg1: memref<3x4xi32, #tpu.memory_space<smem>>) -> (i32, i32, i32) {
    %c0_i32 = arith.constant 0 : i32
    %c0_i32_0 = arith.constant 0 : i32
    %c0_i32_1 = arith.constant 0 : i32
    return %arg0, %c0_i32, %c0_i32_0 : i32, i32, i32
  }
}

</mosaic_0001>

<bundles_post_ra>
// kernel: decoder_decode.1
= control target key start
LH: loop header
LB: loop body
LE: loop exit
PB: predicated region body
PF: predicated region fallthrough
CT: control target
= control target key end

     0   :  { %s3268_s0 = inlined_call_operand.hbm [shape: s32[3,4], index: 0, kind: input, shape index: {}]   ;;  %s3269_s1 = inlined_call_operand.hbm [shape: f32[4,32], index: 1, kind: input, shape index: {}]   ;;  %s3270_s2 = inlined_call_operand.vmem [shape: f32[4,8,32], index: 2, kind: input, shape index: {}]   ;;  %s3271_s3 = inlined_call_operand.hbm [shape: f32[4,8], index: 3, kind: input, shape index: {}]   ;;  %s3272_s4 = inlined_call_operand.hbm [shape: f32[32,1,16], index: 4, kind: input, shape index: {}]   ;;  %s3273_s5 = inlined_call_operand.hbm [shape: f32[32,32], index: 5, kind: input, shape index: {}]   ;;  %s3274_s6 = inlined_call_operand.hbm [shape: f32[32,32], index: 6, kind: input, shape index: {}]   ;;  %s3275_s7 = inlined_call_operand.hbm [shape: f32[1,32], index: 7, kind: input, shape index: {}]   ;;  %s3276_s8 = inlined_call_operand.hbm [shape: f32[1,32], index: 8, kind: input, shape index: {}]   ;;  %s3277_s9 = inlined_call_operand.hbm [shape: f32[16,96], index: 9, kind: input, shape index: {}]   ;;  %s3278_s10 = inlined_call_operand.hbm [shape: f32[32,96], index: 10, kind: input, shape index: {}]   ;;  %s3279_s11 = inlined_call_operand.vmem [shape: f32[1,96], index: 11, kind: input, shape index: {}]   ;;  %s3280_s12 = inlined_call_operand.hbm [shape: f32[32,96], index: 12, kind: input, shape index: {}]   ;;  %s3281_s13 = inlined_call_operand.vmem [shape: f32[1,96], index: 13, kind: input, shape index: {}]   ;;  %s3282_s14 = inlined_call_operand.vmem [shape: f32[32,32], index: 14, kind: input, shape index: {}]   ;;  %s3283_s15 = inlined_call_operand.vmem [shape: f32[32,32], index: 15, kind: input, shape index: {}]   ;;  %s3284_s16 = inlined_call_operand.vmem [shape: f32[16,32], index: 16, kind: input, shape index: {}]   ;;  %s3285_s17 = inlined_call_operand.vmem [shape: f32[1,32], index: 17, kind: input, shape index: {}]   ;;  %s3286_s18 = inlined_call_operand.hbm [shape: f32[3,4,32], index: 18, kind: output, shape index: {0}]   ;;  %s3287_s19 = inlined_call_operand.hbm [shape: f32[3,4,32], index: 19, kind: output, shape index: {1}]   ;;  %s3288_s20 = inlined_call_operand.hbm [shape: f32[3,4,8], index: 20, kind: output, shape index: {2}]  }
   0x1   :  { %3308 = sst [smem:[#allocation42_spill]] %s3268_s0 }
   0x2   :  { %3309 = sst [smem:[#allocation43_spill]] %s3269_s1  ;;  %s2685_s1 = smov [#allocation5]  }
   0x3   :  { %3310 = sst [smem:[#allocation44_spill]] %s3270_s2 }
   0x4   :  { %3311 = sst [smem:[#allocation45_spill]] %s3271_s3 }
   0x5   :  { %3312 = sst [smem:[#allocation46_spill]] %s3272_s4 }
   0x6   :  { %3313 = sst [smem:[#allocation47_spill]] %s3273_s5 }
   0x7   :  { %3314 = sst [smem:[#allocation48_spill]] %s3275_s7 }
   0x8   :  { %3315 = sst [smem:[#allocation49_spill]] %s3277_s9 }
   0x9   :  { %3316 = sst [smem:[#allocation50_spill]] %s3282_s14 }
   0xa   :  { %3317 = sst [smem:[#allocation51_spill]] %s3286_s18 }
   0xb   :  { %s3318_s14 = sld [smem:[#allocation42_spill]] }
  0x11   :  { %27 = dma.hbm_to_smem %s3318_s14, 64, %s2685_s1, [#allocation4] }
  0x12   :  { %2635 = dma.done.wait [#allocation4], 64 }
  0x13   :  { %2636 = vsyncadd [#allocation4], 4294967232 }
  0x14   :  { %29 = sfence }
  0x15   :  { %30 = vsyncpa [#allocation7], 0 }
  0x16   :  { %31 = vsyncpa [#allocation10], 0 }
  0x17   :  { %32 = vsyncpa [#allocation13], 0 }
  0x18   :  { %33 = vsyncpa [#allocation16], 0 }
  0x19   :  { %34 = vsyncpa [#allocation19], 0 }
  0x1a   :  { %35 = vsyncpa [#allocation22], 0 }
  0x1b   :  { %36 = vsyncpa [#allocation8], 0 }
  0x1c   :  { %38 = vsyncpa [#allocation8 + $0x1], 0 }
  0x1d   :  { %39 = vsyncpa [#allocation25], 0 }
  0x1e   :  { %41 = vsyncpa [#allocation25 + $0x1], 0  ;;  %s2817_s24 = smov 0   ;;  %s2819_s2 = smov 0  }
  0x1f   :  { %s2821_s25 = smov 0   ;;  %s2823_s14 = smov 0  }
  0x20 LB: > { %3319 = sst [smem:[#allocation36_spill]] %s2671_s24  ;;  %s2838_s3 = sadd.s32 4294967295, %s2683_s14   ;;  %s2683_s14 = sphi %s2823_s14, %s3365_s14   ;;  %s2679_s25 = sphi %s2821_s25, %s3367_s25   ;;  %s2675_s2 = sphi %s2819_s2, %s3369_s2   ;;  %s2671_s24 = sphi %s2817_s24, %s3368_s24  }
  0x21   : > { %3320 = sst [smem:[#allocation37_spill]] %s2679_s25  ;;  %s3291_s26 = sadd.s32 4294967294, %s2683_s14  }
  0x22   : > { %3321 = sst [smem:[#allocation38_spill]] %s2683_s14  ;;  %s2842_s27 = sadd.s32 1, %s2683_s14  }
  0x23   : > { %3322 = sst [smem:[#allocation39_spill]] %s2842_s27  ;;  %s411_s28 = sadd.s32 1, %s2679_s25 }
  0x24   : > { %s408_s4 = ssub.s32 %s2683_s14, %s2842_s27  ;;  %p421_p0 = scmp.ne.s32.totalorder %s2679_s25, %s2675_s2 }
  0x25   : > { %p409_p1 = scmp.eq.s32.totalorder %s408_s4, 0  ;;  %p422_p2 = scmp.eq.s32.totalorder %s2838_s3, 2 }
  0x26   : > { %p427_p3 = scmp.ne.s32.totalorder %s2675_s2, %s2671_s24  ;;  %p428_p4 = scmp.eq.s32.totalorder %s3291_s26, 2 }
  0x27   : > { %s2855_s29 = scalar_select %p409_p1, %s2679_s25, %s411_s28  }
  0x28   : > { %p2857_p5 = por %p422_p2, %p421_p0  ;;  %p2861_p6 = por %p428_p4, %p427_p3 }
  0x29   : > { %3323 = sst [smem:[#allocation40_spill]] %s2855_s29  ;;  %p1920_p7 = scmp.ge.s32.totalorder %s2683_s14, 1 }
  0x2a   : > { %s3324_s30 = scalar_select %p2857_p5, 1, 0 }
  0x2b   : > { %s3325_s0 = scalar_select %p2861_p6, 1, 0 }
  0x2c   : > { %p487_p8 = scmp.lt.s32.totalorder %s2683_s14, 4  ;;  %p3296_p10 = scmp.eq.s32.totalorder %s2838_s3, 0 }
  0x2d   : > { %3326 = sst [smem:[#allocation41_spill]] %s3325_s0  ;;  %s2686_s1 = smov [#allocation9]  }
  0x2e   : > { %p2869_p11 = pnand %p1920_p7, %p487_p8  ;;  %s514_s22 = sshll.u32 %s2686_s1, 4  ;;  %s515_s22 = int_to_ptr.vmem [resolvable:$true] %s514_s22 }
  0x2f   : > { %s2687_s23 = smov [#allocation12]   ;;  %s2688_s26 = smov [#allocation15]  }
  0x30   : > { %s3327_s21 = scalar_select %p2869_p11, 1, 0 }
  0x31   : > { %p2140_p12 = pneg %p2869_p11  ;;  %s537_s28 = sshll.u32 %s2687_s23, 4  ;;  %s538_s28 = int_to_ptr.vmem [resolvable:$true] %s537_s28 }
  0x32   : > { %s564_s29 = sshll.u32 %s2688_s26, 4  ;;  %s2292_s1 = scalar_lea.vmem %s515_s22, 64  ;;  %s565_s29 = int_to_ptr.vmem [resolvable:$true] %s564_s29 }
  0x33   : > { %p2877_p13 = pnand %p3296_p10, %p2140_p12  ;;  %p2293_p1 = scmp.ne.s32.totalorder %s515_s22, %s2292_s1 }
  0x34   : > { %p2300_p4 = scmp.lt.s32.totalorder %s515_s22, %s515_s22  ;;  %p2301_p7 = scmp.lt.s32.totalorder %s2292_s1, %s2292_s1 }
  0x35   : > { %p2883_p0 = pneg %p2877_p13 }
  0x36   : > { %p2302_p8 = por %p2301_p7, %p2300_p4 }
  0x37   : > { %p2295_p2 = pnand %p2293_p1, %p2883_p0 }
  0x39   : > { %p2296_p3 = pneg %p2295_p2 }
  0x3b   : > { %p2303_p12 = pnand %p2302_p8, %p2296_p3 }
  0x3d   : > { %2306 = shalt.err (!%p2303_p12)
}
  0x3e   : > { %s3330_s27 = sld [smem:[#allocation45_spill]]  ;;  %s2318_s0 = scalar_lea.vmem %s538_s28, 512 }
  0x3f   : > { %p2319_p9 = scmp.ne.s32.totalorder %s538_s28, %s2318_s0  ;;  %p2326_p5 = scmp.lt.s32.totalorder %s538_s28, %s538_s28 }
  0x40   : > { %p2327_p1 = scmp.lt.s32.totalorder %s2318_s0, %s2318_s0 }
  0x41   : > { %p2321_p10 = pnand %p2319_p9, %p2883_p0 }
  0x42   : > { %p2328_p2 = por %p2327_p1, %p2326_p5 }
  0x43   : > { %p2322_p6 = pneg %p2321_p10 }
  0x44   : > { %2146 = dma.hbm_to_vmem [thread:$0]  (!%p2877_p13), %s3330_s27, 64, %s515_s22, [#allocation10]  }
  0x45   : > { %p2329_p11 = pnand %p2328_p2, %p2322_p6 }
  0x47   : > { %2332 = shalt.err (!%p2329_p11)
}
  0x48   : > { %s3302_s1 = smov 128   ;;  %s3304_s24 = smov 8  }
  0x49   : > { %s3331_s5 = sld [smem:[#allocation47_spill]]  ;;  %s2344_s22 = scalar_lea.vmem %s565_s29, 16 }
  0x4a   : > { %p2345_p9 = scmp.ne.s32.totalorder %s565_s29, %s2344_s22  ;;  %s2351_s0 = scalar_lea.vmem %s565_s29, 32 }
  0x4b   : > { %p2352_p6 = scmp.lt.s32.totalorder %s565_s29, %s565_s29  ;;  %p2353_p11 = scmp.lt.s32.totalorder %s2351_s0, %s2344_s22 }
  0x4c   : > { %p2347_p10 = pnand %p2345_p9, %p2883_p0 }
  0x4d   : > { %p2354_p3 = por %p2353_p11, %p2352_p6 }
  0x4e   : > { %p2348_p5 = pneg %p2347_p10 }
  0x4f   : > { %2152 = dma.hbm_to_vmem [thread:$0]  (!%p2877_p13), %s3331_s5, 512, %s538_s28, [#allocation13], %s3302_s1, %s3302_s1, %s3304_s24  }
  0x50   : > { %p2355_p4 = pnand %p2354_p3, %p2348_p5 }
  0x52   : > { %2358 = shalt.err (!%p2355_p4)
}
  0x53   : > { %s3332_s7 = sld [smem:[#allocation48_spill]]  ;;  %s2691_s28 = smov [#allocation18]  }
  0x54   : > { %s585_s23 = sshll.u32 %s2691_s28, 4  ;;  %s2692_s27 = smov [#allocation6]   ;;  %s586_s23 = int_to_ptr.vmem [resolvable:$true] %s585_s23 }
  0x55   : > { %s500_s1 = sshll.u32 %s2692_s27, 4  ;;  %s2370_s24 = scalar_lea.vmem %s586_s23, 256  ;;  %s501_s1 = int_to_ptr.vmem [resolvable:$true] %s500_s1 }
  0x56   : > { %p2371_p7 = scmp.ne.s32.totalorder %s586_s23, %s2370_s24  ;;  %p2378_p1 = scmp.lt.s32.totalorder %s586_s23, %s586_s23 }
  0x57   : > { %p2379_p2 = scmp.lt.s32.totalorder %s2370_s24, %s2370_s24 }
  0x58   : > { %p2373_p8 = pnand %p2371_p7, %p2883_p0 }
  0x59   : > { %2158 = dma.hbm_to_vmem [thread:$0]  (!%p2877_p13), %s3332_s7, 16, %s565_s29, [#allocation16]  }
  0x5a   : > { %p2374_p12 = pneg %p2373_p8  ;;  %p2380_p9 = por %p2379_p2, %p2378_p1 }
  0x5c   : > { %p2381_p10 = pnand %p2380_p9, %p2374_p12 }
  0x5e   : > { %2384 = shalt.err (!%p2381_p10)
}
  0x5f   : > { %s3333_s14 = smov 8   ;;  %s3334_s22 = smov 128  }
  0x60   : > { %s3335_s9 = sld [smem:[#allocation49_spill]]  ;;  %s2396_s26 = scalar_lea.vmem %s501_s1, 64 }
  0x61   : > { %p2397_p5 = scmp.ne.s32.totalorder %s501_s1, %s2396_s26  ;;  %p2404_p3 = scmp.lt.s32.totalorder %s501_s1, %s501_s1 }
  0x62   : > { %p2405_p4 = scmp.lt.s32.totalorder %s2396_s26, %s2396_s26 }
  0x63   : > { %p2399_p6 = pnand %p2397_p5, %p2883_p0 }
  0x64   : > { %p2406_p7 = por %p2405_p4, %p2404_p3 }
  0x65   : > { %p2400_p11 = pneg %p2399_p6 }
  0x66   : > { %2164 = dma.hbm_to_vmem [thread:$0]  (!%p2877_p13), %s3335_s9, 256, %s586_s23, [#allocation19], %s3334_s22, %s3334_s22, %s3333_s14  }
  0x67   : > { %p2407_p8 = pnand %p2406_p7, %p2400_p11 }
  0x69   : > { %2410 = shalt.err (!%p2407_p8)
}
  0x6a   : > { %s3336_s27 = sld [smem:[#allocation43_spill]]  ;;  %s2693_s29 = smov [#allocation11]  }
  0x6b   : > { %s524_s23 = sshll.u32 %s2693_s29, 4  ;;  %s525_s23 = int_to_ptr.vmem [resolvable:$true] %s524_s23 }
  0x6c   : > { %s2422_s0 = scalar_lea.vmem %s525_s23, 512  ;;  %p2430_p9 = scmp.lt.s32.totalorder %s525_s23, %s525_s23 }
  0x6d   : > { %p2423_p12 = scmp.ne.s32.totalorder %s525_s23, %s2422_s0  ;;  %p2431_p10 = scmp.lt.s32.totalorder %s2422_s0, %s2422_s0 }
  0x6f   : > { %p2425_p1 = pnand %p2423_p12, %p2883_p0  ;;  %p2432_p5 = por %p2431_p10, %p2430_p9 }
  0x70   : > { %2143 = dma.hbm_to_vmem [thread:$0]  (!%p2877_p13), %s3336_s27, 64, %s501_s1, [#allocation7]  }
  0x71   : > { %p2426_p2 = pneg %p2425_p1 }
  0x73   : > { %p2433_p6 = pnand %p2432_p5, %p2426_p2 }
  0x75   : > { %2436 = shalt.err (!%p2433_p6)
}
  0x76   : > { %s2694_s26 = smov 16   ;;  %s2695_s5 = smov 1  }
  0x77   : > { %s3337_s28 = sld [smem:[#allocation46_spill]]  ;;  %s2696_s27 = smov [#allocation14]  }
  0x78   : > { %s550_s29 = sshll.u32 %s2696_s27, 4  ;;  %s2697_s7 = smov [#allocation17]   ;;  %s551_s29 = int_to_ptr.vmem [resolvable:$true] %s550_s29 }
  0x79   : > { %s575_s9 = sshll.u32 %s2697_s7, 4  ;;  %s2448_s18 = scalar_lea.vmem %s551_s29, 512  ;;  %s576_s9 = int_to_ptr.vmem [resolvable:$true] %s575_s9 }
  0x7a   : > { %p2449_p11 = scmp.ne.s32.totalorder %s551_s29, %s2448_s18  ;;  %p2456_p7 = scmp.lt.s32.totalorder %s551_s29, %s551_s29 }
  0x7b   : > { %p2457_p8 = scmp.lt.s32.totalorder %s2448_s18, %s2448_s18 }
  0x7c   : > { %p2451_p3 = pnand %p2449_p11, %p2883_p0 }
  0x7d   : > { %2149 = dma.hbm_to_vmem [thread:$0]  (!%p2877_p13), %s3337_s28, 512, %s525_s23, [#allocation10], %s2694_s26, %s2694_s26, %s2695_s5  }
  0x7e   : > { %p2452_p4 = pneg %p2451_p3  ;;  %p2458_p12 = por %p2457_p8, %p2456_p7 }
  0x80   : > { %p2459_p1 = pnand %p2458_p12, %p2452_p4 }
  0x82   : > { %2462 = shalt.err (!%p2459_p1)
}
  0x83   : > { %2155 = dma.hbm_to_vmem [thread:$0]  (!%p2877_p13), %s3274_s6, 512, %s551_s29, [#allocation13], %s3334_s22, %s3334_s22, %s3333_s14  }
  0x84   : > { %s2474_s7 = scalar_lea.vmem %s576_s9, 16  ;;  %s2481_s0 = scalar_lea.vmem %s576_s9, 32 }
  0x85   : > { %p2475_p2 = scmp.ne.s32.totalorder %s576_s9, %s2474_s7  ;;  %p2482_p5 = scmp.lt.s32.totalorder %s576_s9, %s576_s9 }
  0x86   : > { %p2483_p6 = scmp.lt.s32.totalorder %s2481_s0, %s2474_s7 }
  0x87   : > { %p2477_p9 = pnand %p2475_p2, %p2883_p0 }
  0x88   : > { %p2484_p11 = por %p2483_p6, %p2482_p5 }
  0x89   : > { %p2478_p10 = pneg %p2477_p9 }
  0x8b   : > { %p2485_p3 = pnand %p2484_p11, %p2478_p10 }
  0x8d   : > { %2488 = shalt.err (!%p2485_p3)
}
  0x8e   : > { %2161 = dma.hbm_to_vmem [thread:$0]  (!%p2877_p13), %s3276_s8, 16, %s576_s9, [#allocation16]  }
  0x8f   : > { %s2698_s24 = smov [#allocation20]   ;;  %s2699_s28 = smov [#allocation21]  }
  0x90   : > { %s598_s1 = sshll.u32 %s2698_s24, 4  ;;  %s614_s27 = sshll.u32 %s2699_s28, 4  ;;  %s599_s1 = int_to_ptr.vmem [resolvable:$true] %s598_s1  ;;  %s615_s27 = int_to_ptr.vmem [resolvable:$true] %s614_s27 }
  0x91   : > { %s2500_s29 = scalar_lea.vmem %s599_s1, 512  ;;  %p2508_p12 = scmp.lt.s32.totalorder %s599_s1, %s599_s1 }
  0x92   : > { %p2501_p4 = scmp.ne.s32.totalorder %s599_s1, %s2500_s29  ;;  %p2509_p1 = scmp.lt.s32.totalorder %s2500_s29, %s2500_s29 }
  0x94   : > { %p2503_p7 = pnand %p2501_p4, %p2883_p0  ;;  %p2510_p2 = por %p2509_p1, %p2508_p12 }
  0x96   : > { %p2504_p8 = pneg %p2503_p7 }
  0x98   : > { %p2511_p9 = pnand %p2510_p2, %p2504_p8 }
  0x9a   : > { %2514 = shalt.err (!%p2511_p9)
}
  0x9b   : > { %2167 = dma.hbm_to_vmem [thread:$0]  (!%p2877_p13), %s3278_s10, 512, %s599_s1, [#allocation19], %s3334_s22, %s3334_s22, %s3333_s14  }
  0x9c   : > { %s2526_s23 = scalar_lea.vmem %s615_s27, 512  ;;  %p2534_p11 = scmp.lt.s32.totalorder %s615_s27, %s615_s27 }
  0x9d   : > { %p2527_p10 = scmp.ne.s32.totalorder %s615_s27, %s2526_s23  ;;  %p2535_p3 = scmp.lt.s32.totalorder %s2526_s23, %s2526_s23 }
  0x9f   : > { %p2529_p5 = pnand %p2527_p10, %p2883_p0  ;;  %p2536_p4 = por %p2535_p3, %p2534_p11 }
  0xa1   : > { %p2530_p6 = pneg %p2529_p5 }
  0xa3   : > { %p2537_p7 = pnand %p2536_p4, %p2530_p6 }
  0xa5   : > { %2540 = shalt.err (!%p2537_p7)
}
  0xa6   : > { %2170 = dma.hbm_to_vmem [thread:$0]  (!%p2877_p13), %s3280_s12, 512, %s615_s27, [#allocation22], %s3334_s22, %s3334_s22, %s3333_s14  }
  0xa7   : > { %p3338_p8 = scmp.ne.s32.totalorder %s3327_s21, 0 }
  0xa8   : > { %p3339_p0 = scmp.eq.s32.totalorder (!%p3338_p8), %s2838_s3, 0 }
  0xa9   : > { %645 = sbr.rel (%p3338_p8) target bundleno = 1928 (0x788), region = 88 }
  0xae   : > { %2638 = dma.done.wait (%p3339_p0), [#allocation7], 64   ;;  %p3340_p12 = pmov %p3339_p0 }
  0xaf   : > { %p3341_p1 = pmov %p3339_p0 }
  0xb0   : > { %2640 = vsyncadd (%p3340_p12), [#allocation7], 4294967232 }
  0xb1   : > { %2642 = dma.done.wait (%p3341_p1), [#allocation10], 576   ;;  %p3342_p2 = pmov %p3339_p0 }
  0xb2   : > { %p3343_p9 = pmov %p3339_p0 }
  0xb3   : > { %2644 = vsyncadd (%p3342_p2), [#allocation10], 4294966720 }
  0xb4   : > { %2646 = dma.done.wait (%p3343_p9), [#allocation13], 1024   ;;  %p3344_p13 = pmov %p3339_p0 }
  0xb5   : > { %p3345_p10 = pmov %p3339_p0 }
  0xb6   : > { %2648 = vsyncadd (%p3344_p13), [#allocation13], 4294966272 }
  0xb7   : > { %2650 = dma.done.wait (%p3345_p10), [#allocation16], 32   ;;  %p3346_p5 = pmov %p3339_p0 }
  0xb8   : > { %p3347_p6 = pmov %p3339_p0 }
  0xb9   : > { %2652 = vsyncadd (%p3346_p5), [#allocation16], 4294967264 }
  0xba   : > { %2654 = dma.done.wait (%p3347_p6), [#allocation19], 768   ;;  %p3348_p11 = pmov %p3339_p0 }
  0xbb   : > { %p3349_p3 = pmov %p3339_p0 }
  0xbc   : > { %2656 = vsyncadd (%p3348_p11), [#allocation19], 4294966528 }
  0xbd   : > { %2658 = dma.done.wait (%p3349_p3), [#allocation22], 512   ;;  %p3350_p4 = pmov %p3339_p0 }
  0xbe   : > { %s3307_s25 = sand.u32 1, %s2675_s2   ;;  %p3351_p7 = scmp.ne.s32.totalorder %s2838_s3, 0 }
  0xbf   : > { %2660 = vsyncadd (%p3350_p4), [#allocation22], 4294966784  ;;  %s3001_s21 = sshll.u32 %s3307_s25, 2 }
  0xc0   : > { %s734_s14 = scalar_lea.vmem [#allocation24], %s3001_s21  ;;  %s741_s22 = scalar_lea.vmem [#allocation26], %s3001_s21 }
  0xc1   : > { %745 = sbr.rel (%p3351_p7) target bundleno = 200 (0xc8), region = 132 }
  0xc6   : > { %v746_v0 = vld [vmem:[#allocation6] sm:$0xf]  ;;  %vm747_vm0 = vcmask 257024  }
  0xc7   : > { %748 = vst.msk [vmem:[#allocation2] sm:$0xf] %vm747_vm0, %v746_v0 }
  0xc8 PF: > { %v779_v1 = vld [vmem:[#allocation12 + $0x18] sm:$0xff]  ;;  %v2700_v3 = vmov 0.0   ;;  %v778_v4 = vld [vmem:[#allocation12 + $0x10] sm:$0xff]  ;;  %v862_v6 = vld [vmem:[#allocation14 + $0x8] sm:$0xff]  ;;  %vm2701_vm1 = vmmov 0   ;;  %vm787_vm2 = vcmask 261120   ;;  %v966_v17 = vlaneseq }
  0xc9   : > { %v864_v2 = vld [vmem:[#allocation14 + $0x18] sm:$0xff]  ;;  %2011 = vmatprep.subr.mxu0 %v2700_v3  ;;  %v863_v5 = vld [vmem:[#allocation14 + $0x10] sm:$0xff]  ;;  %v777_v7 = vld [vmem:[#allocation12 + $0x8] sm:$0xff]  ;;  %2019 = vmatprep.mubr.msk.f32.mxu0 %vm2701_vm1, %v2700_v3  ;;  %s3352_s24 = sld [smem:[#allocation44_spill]]  ;;  %v2702_v15 = vmov 1966171168  }
  0xca   : > { %2022 = vmatprep.subr.mxu1 %v864_v2  ;;  %2012 = vmatpush3.msra.mxu0 %v779_v1  ;;  %v776_v8 = vld [vmem:[#allocation12] sm:$0xff]  ;;  %v964_v16 = vunpack.c.l.s4 %v2702_v15  ;;  %v3052_v19 = vshrl.u32 %v966_v17, 7  ;;  %v1045_v57 = vand.u32 127, %v966_v17  ;;  %vm1062_vm3 = vcmask 1041409   ;;  %v1038_v0 = vld [vmem:[#allocation9] sm:$0xf] }
  0xcb   : > { %2023 = vmatpush3.msra.mxu1 %v864_v2  ;;  %2013 = vmatprep.subr.mxu0 %v2700_v3  ;;  %v861_v9 = vld [vmem:[#allocation14] sm:$0xff]  ;;  %vm1064_vm4 = vcmask 1042434   ;;  %vm1066_vm5 = vcmask 1043459   ;;  %vm1039_vm6 = vcmp.lt.f32.partialorder %v1038_v0, 0.5  ;;  %vm1070_vm7 = vcmask 60416   ;;  %s1946_s7 = sshll.u32 %s2838_s3, 7 }
  0xcc   : > { %2024 = vmatprep.subr.mxu1 %v863_v5  ;;  %2014 = vmatpush3.msra.mxu0 %v778_v4  ;;  %v965_v18 = vunpack.c.0.s8 %v964_v16  ;;  %v1947_v20 = vld [vmem:[#allocation15] ss:$0 sm:$0xff]  ;;  %v3056_v27 = vsub.s32 0, %v3052_v19  ;;  %v1953_v44 = vld [vmem:[#allocation17] ss:$0 sm:$0xff]  ;;  %v1048_v59 = vsub.s32 %v1045_v57, %v3052_v19  ;;  %s760_s0 = sadd.s32 1, %s1946_s7 }
  0xcd   : > { %2025 = vmatpush3.msra.mxu1 %v863_v5  ;;  %2015 = vmatprep.subr.mxu0 %v2700_v3  ;;  %s765_s18 = sadd.s32 2, %s1946_s7  ;;  %s755_s26 = sld [smem:[#allocation5 + %s1946_s7]]  ;;  %vm758_vm8 = vcmask 122880   ;;  %vm1227_vm9 = vcmask 130048   ;;  %vm1654_vm10 = vcmask 257024  }
  0xce   : > { %2026 = vmatprep.subr.mxu1 %v862_v6  ;;  %2016 = vmatpush3.msra.mxu0 %v777_v7  ;;  %v3013_v10 = vld [vmem:[#allocation2] sm:$0xf]  ;;  %v968_v21 = vsub.s32 %v965_v18, %v3052_v19  ;;  %s761_s28 = sld [smem:[#allocation5 + %s760_s0]]  ;;  %p3355_p0 = scmp.ne.s32.totalorder %s3324_s30, 0 }
  0xcf   : > { %2017 = vmatprep.subr.mxu0 %v2700_v3  ;;  %2027 = vmatpush3.msra.mxu1 %v862_v6  ;;  %s3353_s1 = smov %s3352_s24  ;;  %v3019_v11 = vld [vmem:[%s3352_s24] sm:$0xff]  ;;  %s770_s24 = sadd.s32 3, %s1946_s7 }
  0xd0   : > { %2018 = vmatpush3.msra.mxu0 %v776_v8  ;;  %2028 = vmatprep.subr.mxu1 %v861_v9  ;;  %v3024_v12 = vld [vmem:[%s3353_s1 + $0x8] sm:$0xff]  ;;  %v3031_v13 = vld [vmem:[%s3353_s1 + $0x10] sm:$0xff]  ;;  %v3044_v14 = vld [vmem:[%s3353_s1 + $0x18] sm:$0xff]  ;;  %s766_s27 = sld [smem:[#allocation5 + %s765_s18]]  ;;  %s1696_s18 = sshll.u32 %s734_s14, 4  ;;  %s1697_s18 = int_to_ptr.vmem [resolvable:$true] %s1696_s18 }
  0xd1   : > { %2020 = vmatmul.mubr.msk.f32.vlgmr.msra.gmra.mxu0 %vm787_vm2, %v3013_v10  ;;  %2029 = vmatpush3.msra.mxu1 %v861_v9  ;;  %s771_s29 = sld [smem:[#allocation5 + %s770_s24]]  ;;  %s2541_s24 = scalar_lea.vmem %s1697_s18, 64 }
  0xd2   : > { %2030 = vmatprep.mubr.msk.f32.mxu1 %vm787_vm2, %v3019_v11  ;;  %2047 = vmatprep.subr.mxu1 %v2700_v3  ;;  %p2542_p8 = scmp.ne.s32.totalorder %s1697_s18, %s2541_s24 }
  0xd3   : > { %2031 = vmatmul.mubr.msk.f32.vlgmr.msra.gmra.mxu1 %vm787_vm2, %v3024_v12  ;;  %2036 = vmatprep.subr.mxu0 %v2700_v3  ;;  %s756_s9 = scalar_lea.vmem [#allocation11], %s755_s26  ;;  %s2704_s26 = smov 32  }
  0xd4   : > { %2033 = vmatprep.mubr.msk.f32.mxu1 %vm787_vm2, %v3031_v13  ;;  %2044 = vmatprep.mubr.msk.f32.mxu0 %vm2701_vm1, %v2700_v3  ;;  %s762_s5 = scalar_lea.vmem [#allocation11], %s761_s28  ;;  %p2543_p12 = pnand %p2542_p8, %p3355_p0 }
  0xd5   : > { %s2706_s28 = smov [#allocation24]  }
  0xd6   : > { %s767_s23 = scalar_lea.vmem [#allocation11], %s766_s27  ;;  %s3354_s27 = sld [smem:[#allocation50_spill]] }
  0xd7   : > { %2034 = vmatmul.mubr.msk.f32.gmra.mxu1 %vm787_vm2, %v3044_v14  ;;  %s772_s7 = scalar_lea.vmem [#allocation11], %s771_s29  ;;  %s2705_s29 = smov 96  }
  0xd8   : > { %2051 = vmatprep.mubr.msk.f32.mxu1 %vm2701_vm1, %v2700_v3  ;;  %p2544_p1 = pneg %p2543_p12 }
 0x191   : > { %v857_v22 = vpop.f32.mrf.mxu0 }
 0x192   : > { %v858_v23 = vadd.f32 %v1947_v20, %v857_v22  ;;  %v1091_v22 = vsub.s32 1, %v3052_v19 }
 0x193   : > { %v2021_v24 = vpop.f32.mrf.mxu0  ;;  %v2032_v25 = vpop.f32.mrf.mxu1 }
 0x194   : > { %v969_v26 = vrot.slane %v858_v23, %v968_v21  ;;  %v757_v24 = vld [vmem:[%s756_s9] sm:$0x1]  ;;  %s1664_s9 = sand.u32 1, %s2838_s3  }
 0x195   : > { %v943_v28 = vpop.f32.mrf.mxu1  ;;  %759 = vst.msk [vmem:[#allocation3] sm:$0x1] %vm758_vm8, %v757_v24  ;;  %v1311_v24 = vld [vmem:[#allocation21 + $0x10] sm:$0xff] }
 0x196   : > { %v970_v29 = vcombine.high %v969_v26, %v969_v26  ;;  %v977_v30 = vrot.slane %v969_v26, %v968_v21  ;;  %v763_v26 = vld [vmem:[%s762_s5] sm:$0x1]  ;;  %s3179_s5 = sshll.u32 %s2838_s3, 6 }
 0x197   : > { %v2035_v31 = vpop.f32.mrf.mxu1  ;;  %764 = vst.msk [vmem:[#allocation3 + $0x1] sm:$0x1] %vm758_vm8, %v763_v26  ;;  %v1309_v26 = vld [vmem:[#allocation21] sm:$0xff]  ;;  %s1694_s0 = scalar_lea.hbm %s3287_s19, %s3179_s5 }
 0x198   : > { %v984_v32 = vrot.slane %v970_v29, %v968_v21  ;;  %v990_v33 = vrot.slane %v977_v30, %v3056_v27  ;;  %v985_v34 = vcombine.high %v977_v30, %v977_v30 }
 0x199   : > { %v953_v39 = vpop.f32.mrf.mxu1 }
 0x19a   : > { %v994_v35 = vrot.slane %v984_v32, %v3056_v27  ;;  %v1007_v36 = vadd.f32 %v990_v33, %v943_v28  ;;  %v986_v37 = vcombine.high %v984_v32, %v984_v32  ;;  %v998_v38 = vrot.slane %v985_v34, %v3056_v27  ;;  %v768_v28 = vld [vmem:[%s767_s23] sm:$0x1]  ;;  %v1142_v34 = vld [vmem:[#allocation18] sm:$0xff] }
 0x19b   : > { %769 = vst.msk [vmem:[#allocation3 + $0x2] sm:$0x1] %vm758_vm8, %v768_v28  ;;  %v773_v32 = vld [vmem:[%s772_s7] sm:$0x1]  ;;  %s2703_s7 = smov 64  }
 0x19c   : > { %v1008_v40 = vadd.f32 %v2032_v25, %v994_v35  ;;  %2255 = vtanh.f32 %v1007_v36  ;;  %v1002_v41 = vrot.slane %v986_v37, %v3056_v27  ;;  %v1009_v42 = vadd.f32 %v998_v38, %v953_v39  ;;  %v1143_v33 = vld [vmem:[#allocation18 + $0x8] sm:$0xff]  ;;  %774 = vst.msk [vmem:[#allocation3 + $0x3] sm:$0x1] %vm758_vm8, %v773_v32 }
 0x19d   : > { %2048 = vmatpush3.msra.mxu1 %v1143_v33  ;;  %v1105_v36 = vsub.s32 3, %v3052_v19  ;;  %v1147_v37 = vld [vmem:[#allocation20 + $0x18] sm:$0xff] }
 0x19e   : > { %2257 = vtanh.f32 %v1008_v40  ;;  %v1010_v43 = vadd.f32 %v2035_v31, %v1002_v41  ;;  %v1098_v31 = vsub.s32 2, %v3052_v19  ;;  %2049 = vmatprep.subr.mxu1 %v2700_v3  ;;  %2037 = vmatpush3.msra.mxu0 %v1147_v37  ;;  %v1426_v38 = vld [vmem:[%s3283_s15 + $0x18] sm:$0xff]  ;;  %v1145_v19 = vld [vmem:[#allocation20 + $0x8] sm:$0xff] }
 0x19f   : > { %2259 = vtanh.f32 %v1009_v42  ;;  %2050 = vmatpush3.msra.mxu1 %v1142_v34  ;;  %2038 = vmatprep.subr.mxu0 %v2700_v3  ;;  %v1425_v41 = vld [vmem:[%s3283_s15 + $0x10] sm:$0xff]  ;;  %v1144_v42 = vld [vmem:[#allocation20] sm:$0xff]  ;;  %v1957_v34 = vld [vmem:[%s3281_s13] ss:$0 sm:$0xff] }
 0x1a0   : > { %2261 = vtanh.f32 %v1010_v43  ;;  %2065 = vmatprep.subr.mxu1 %v2700_v3  ;;  %v1424_v43 = vld [vmem:[%s3283_s15 + $0x8] sm:$0xff] }
 0x1a3   : > { %v3090_v40 = vld [vmem:[#allocation3] sm:$0xf] }
 0x1a4   : > { %2052 = vmatmul.mubr.msk.f32.vlgmr.msra.gmra.mxu1 %vm1227_vm9, %v3090_v40 }
 0x1a5   : > { %2066 = vmatpush3.msra.mxu1 %v1426_v38  ;;  %2073 = vmatprep.mubr.msk.f32.mxu1 %vm2701_vm1, %v2700_v3  ;;  %v1956_v38 = vld [vmem:[%s3279_s11] ss:$0 sm:$0xff] }
 0x1a6   : > { %2067 = vmatprep.subr.mxu1 %v2700_v3 }
 0x1a7   : > { %2068 = vmatpush3.msra.mxu1 %v1425_v41 }
 0x1a8   : > { %2069 = vmatprep.subr.mxu1 %v2700_v3 }
 0x1a9   : > { %v2256_v45 = vpop.eup %2255  ;;  %2070 = vmatpush3.msra.mxu1 %v1424_v43 }
 0x1aa   : > { %v1022_v46 = vmul.f32 %v2256_v45, %v1953_v44  ;;  %2071 = vmatprep.subr.mxu1 %v2700_v3 }
 0x1ab   : > { %v2258_v47 = vpop.eup %2257 }
 0x1ac   : > { %v2260_v48 = vpop.eup %2259  ;;  %v1026_v49 = vsel %vm787_vm2, %v1022_v46, 0.0  ;;  %v1023_v50 = vmul.f32 %v2258_v47, %v1953_v44 }
 0x1ad   : > { %v2262_v51 = vpop.eup %2261  ;;  %1027 = vadd.xlane.f32.xlu0 %v1026_v49  ;;  %v1024_v52 = vmul.f32 %v2260_v48, %v1953_v44 }
 0x1ae   : > { %v1025_v54 = vmul.f32 %v2262_v51, %v1953_v44  ;;  %v1029_v55 = vsel %vm787_vm2, %v1023_v50, 0.0  ;;  %v1423_v44 = vld [vmem:[%s3283_s15] sm:$0xff] }
 0x1af   : > { %v1032_v53 = vsel %vm787_vm2, %v1024_v52, 0.0  ;;  %2072 = vmatpush3.msra.mxu1 %v1423_v44 }
 0x1b0   : > { %1033 = vadd.xlane.f32.xlu1 %v1032_v53  ;;  %v1035_v56 = vsel %vm787_vm2, %v1025_v54, 0.0  ;;  %2087 = vmatprep.subr.mxu1 %v2700_v3 }
 0x1b1   : > { %1030 = vadd.xlane.f32.xlu0 %v1029_v55 }
 0x1b4   : > { %1036 = vadd.xlane.f32.xlu1 %v1035_v56 }
 0x236   : > { %v1028_v58 = vpop.xlane.xlu0 %1027 }
 0x237   : > { %v1049_v62 = vrot.slane %v1028_v58, %v1048_v59 }
 0x239   : > { %v1034_v60 = vpop.xlane.xlu1 %1033 }
 0x23a   : > { %v1031_v61 = vpop.xlane.xlu0 %1030  ;;  %v1057_v1 = vrot.slane %v1034_v60, %v1048_v59 }
 0x23b   : > { %v1053_v63 = vrot.slane %v1031_v61, %v1048_v59 }
 0x23d   : > { %v1063_v2 = vsel %vm1062_vm3, %v1053_v63, %v1049_v62  ;;  %v1037_v4 = vpop.xlane.xlu1 %1036 }
 0x23e   : > { %v1061_v5 = vrot.slane %v1037_v4, %v1048_v59  ;;  %v1065_v6 = vsel %vm1064_vm4, %v1057_v1, %v1063_v2 }
 0x240   : > { %v1067_v7 = vsel %vm1066_vm5, %v1061_v5, %v1065_v6 }
 0x241   : > { %v1069_v8 = vsel %vm1039_vm6, -1e+10, %v1067_v7 }
 0x242   : > { %v1071_v9 = vsel %vm1070_vm7, %v1069_v8, -inf }
 0x243   : > { %1072 = vmax.xlane.f32.xlu0 %v1071_v9 }
 0x264   : > { %v1297_v28 = vpop.f32.mrf.mxu1 }
 0x2cc   : > { %v1073_v15 = vpop.xlane.xlu0 %1072 }
 0x2cd   : > { %v1074_v16 = vsub.f32 %v1069_v8, %v1073_v15 }
 0x2cf   : > { %v1075_v17 = vmul.f32 1.442695, %v1074_v16 }
 0x2d1   : > { %2263 = vpow2.f32 %v1075_v17 }
 0x2de   : > { %v2264_v18 = vpop.eup %2263 }
 0x2df   : > { %v1077_v20 = vsel %vm1070_vm7, %v2264_v18, 0.0 }
 0x2e0   : > { %1078 = vadd.xlane.f32.xlu1 %v1077_v20 }
 0x369   : > { %v1079_v21 = vpop.xlane.xlu1 %1078 }
 0x36a   : > { %2265 = vrcp.f32 %v1079_v21 }
 0x377   : > { %v2266_v23 = vpop.eup %2265 }
 0x378   : > { %v1081_v25 = vmul.f32 %v2266_v23, %v2264_v18 }
 0x37a   : > { %v1092_v29 = vrot.slane %v1081_v25, %v1091_v22  ;;  %1658 = vst.msk [vmem:[%s741_s22] sm:$0xf] %vm1070_vm7, %v1081_v25  ;;  %v1085_v30 = vrot.slane %v1081_v25, %v3056_v27  ;;  %v1099_v35 = vrot.slane %v1081_v25, %v1098_v31  ;;  %v1146_v27 = vld [vmem:[#allocation20 + $0x10] sm:$0xff]  ;;  %v1106_v39 = vrot.slane %v1081_v25, %v1105_v36  ;;  %v1312_v22 = vld [vmem:[#allocation21 + $0x18] sm:$0xff]  ;;  %v1310_v25 = vld [vmem:[#allocation21 + $0x8] sm:$0xff] }
 0x37b   : > { %2039 = vmatpush3.msra.mxu0 %v1146_v27 }
 0x37c   : > { %1094 = vbcast.lane.b32.xlu1 %v1092_v29, 256  ;;  %1087 = vbcast.lane.b32.xlu0 %v1085_v30, 256  ;;  %v2053_v29 = vpop.f32.mrf.mxu1 }
 0x37d   : > { %2040 = vmatprep.subr.mxu0 %v2700_v3 }
 0x37e   : > { %2041 = vmatpush3.msra.mxu0 %v1145_v19 }
 0x37f   : > { %2042 = vmatprep.subr.mxu0 %v2700_v3 }
 0x380   : > { %1101 = vbcast.lane.b32.xlu1 %v1099_v35, 256  ;;  %2043 = vmatpush3.msra.mxu0 %v1144_v42 }
 0x381   : > { %2054 = vmatprep.subr.mxu0 %v2700_v3 }
 0x384   : > { %1108 = vbcast.lane.b32.xlu1 %v1106_v39, 256 }
 0x3ee   : > { %v1095_v45 = vpop.permute.xlu1 %1094  ;;  %v1088_v46 = vpop.permute.xlu0 %1087 }
 0x3ef   : > { %v1111_v47 = vmul.f32 %v1095_v45, %v3024_v12  ;;  %v1110_v48 = vmul.f32 %v1088_v46, %v3019_v11 }
 0x3f1   : > { %v1121_v49 = vsel %vm787_vm2, %v1111_v47, 0.0  ;;  %v1114_v50 = vsel %vm787_vm2, %v1110_v48, 0.0 }
 0x3f2   : > { %v1122_v51 = vrot.slane %v1121_v49, 4  ;;  %v1115_v52 = vrot.slane %v1114_v50, 4  ;;  %v1102_v53 = vpop.permute.xlu1 %1101 }
 0x3f3   : > { %v1112_v54 = vmul.f32 %v1102_v53, %v3031_v13  ;;  %v1419_v53 = vld [vmem:[%s3354_s27] sm:$0xff] }
 0x3f4   : > { %v1123_v55 = vadd.f32 %v1122_v51, %v1121_v49  ;;  %v1116_v56 = vadd.f32 %v1115_v52, %v1114_v50  ;;  %v1422_v49 = vld [vmem:[%s3354_s27 + $0x18] sm:$0xff]  ;;  %v1421_v50 = vld [vmem:[%s3354_s27 + $0x10] sm:$0xff]  ;;  %v1573_v51 = vld [vmem:[%s3284_s16 + $0x8] sm:$0xff] }
 0x3f5   : > { %v1128_v57 = vsel %vm787_vm2, %v1112_v54, 0.0  ;;  %v1420_v52 = vld [vmem:[%s3354_s27 + $0x8] sm:$0xff] }
 0x3f6   : > { %v1124_v58 = vrot.slane %v1123_v55, 2  ;;  %v1117_v59 = vrot.slane %v1116_v56, 2  ;;  %v1129_v60 = vrot.slane %v1128_v57, 4  ;;  %v1109_v61 = vpop.permute.xlu1 %1108 }
 0x3f7   : > { %v1113_v12 = vmul.f32 %v1109_v61, %v3044_v14 }
 0x3f8   : > { %v1125_v11 = vadd.f32 %v1124_v58, %v1123_v55  ;;  %v1118_v62 = vadd.f32 %v1117_v59, %v1116_v56  ;;  %v1130_v63 = vadd.f32 %v1129_v60, %v1128_v57 }
 0x3f9   : > { %v1135_v0 = vsel %vm787_vm2, %v1113_v12, 0.0 }
 0x3fa   : > { %v1131_v1 = vrot.slane %v1130_v63, 2  ;;  %v1136_v2 = vrot.slane %v1135_v0, 4  ;;  %v1126_v4 = vrot.slane %v1125_v11, 1  ;;  %v1119_v5 = vrot.slane %v1118_v62, 1 }
 0x3fc   : > { %v1132_v13 = vadd.f32 %v1131_v1, %v1130_v63  ;;  %v1137_v6 = vadd.f32 %v1136_v2, %v1135_v0  ;;  %v1127_v9 = vadd.f32 %v1126_v4, %v1125_v11  ;;  %v1120_v15 = vadd.f32 %v1119_v5, %v1118_v62 }
 0x3fe   : > { %v1133_v7 = vrot.slane %v1132_v13, 1  ;;  %v1138_v8 = vrot.slane %v1137_v6, 2  ;;  %v1152_v14 = vsel %vm1062_vm3, %v1127_v9, %v1120_v15 }
 0x400   : > { %v1139_v16 = vadd.f32 %v1138_v8, %v1137_v6  ;;  %v1134_v17 = vadd.f32 %v1133_v7, %v1132_v13 }
 0x402   : > { %v1140_v18 = vrot.slane %v1139_v16, 1  ;;  %v1153_v21 = vsel %vm1064_vm4, %v1134_v17, %v1152_v14 }
 0x404   : > { %v1141_v20 = vadd.f32 %v1140_v18, %v1139_v16 }
 0x406   : > { %v1154_v23 = vsel %vm1066_vm5, %v1141_v20, %v1153_v21 }
 0x407   : > { %2045 = vmatmul.mubr.msk.f32.vlgmr.msra.gmra.mxu0 %vm787_vm2, %v1154_v23  ;;  %2074 = vmatmul.mubr.msk.f32.vlgmr.msra.gmra.mxu1 %vm787_vm2, %v1154_v23 }
 0x408   : > { %2055 = vmatpush3.msra.mxu0 %v1312_v22  ;;  %2062 = vmatprep.mubr.msk.f32.mxu0 %vm2701_vm1, %v2700_v3 }
 0x409   : > { %2056 = vmatprep.subr.mxu0 %v2700_v3  ;;  %2091 = vmatprep.mubr.msk.f32.mxu1 %vm2701_vm1, %v2700_v3 }
 0x40a   : > { %2057 = vmatpush3.msra.mxu0 %v1311_v24  ;;  %2088 = vmatpush3.msra.mxu1 %v1573_v51 }
 0x40b   : > { %2058 = vmatprep.subr.mxu0 %v2700_v3  ;;  %2089 = vmatprep.subr.mxu1 %v2700_v3 }
 0x40c   : > { %2059 = vmatpush3.msra.mxu0 %v1310_v25 }
 0x40d   : > { %2060 = vmatprep.subr.mxu0 %v2700_v3 }
 0x40e   : > { %2061 = vmatpush3.msra.mxu0 %v1309_v26 }
 0x40f   : > { %2063 = vmatmul.mubr.msk.f32.vlgmr.msra.gmra.mxu0 %vm787_vm2, %v3013_v10  ;;  %2076 = vmatprep.subr.mxu0 %v2700_v3 }
 0x410   : > { %2084 = vmatprep.mubr.msk.f32.mxu0 %vm2701_vm1, %v2700_v3  ;;  %2077 = vmatpush3.msra.mxu0 %v1422_v49 }
 0x411   : > { %2078 = vmatprep.subr.mxu0 %v2700_v3 }
 0x412   : > { %2079 = vmatpush3.msra.mxu0 %v1421_v50 }
 0x413   : > { %2080 = vmatprep.subr.mxu0 %v2700_v3 }
 0x414   : > { %2081 = vmatpush3.msra.mxu0 %v1420_v52 }
 0x415   : > { %2082 = vmatprep.subr.mxu0 %v2700_v3 }
 0x416   : > { %2083 = vmatpush3.msra.mxu0 %v1419_v53 }
 0x4c7   : > { %v1223_v30 = vpop.f32.mrf.mxu0  ;;  %v3137_v31 = vpop.f32.mrf.mxu1 }
 0x4c8   : > { %v1298_v27 = vadd.f32 %v1297_v28, %v1223_v30 }
 0x4c9   : > { %v2046_v32 = vpop.f32.mrf.mxu0  ;;  %v2075_v33 = vpop.f32.mrf.mxu1 }
 0x4ca   : > { %v1308_v39 = vadd.f32 %v1956_v38, %v1298_v27 }
 0x4cf   : > { %v1386_v35 = vpop.f32.mrf.mxu0 }
 0x4d0   : > { %v1387_v36 = vadd.f32 %v1957_v34, %v1386_v35 }
 0x4d1   : > { %v2064_v37 = vpop.f32.mrf.mxu0 }
 0x4d2   : > { %1398 = vrot.lane.b32.xlu0 %v1387_v36, %s2703_s7  ;;  %v1390_v19 = vadd.f32 %v1387_v36, %v1308_v39 }
 0x4d4   : > { %v1959_v41 = vmul.f32 -1.442695, %v1390_v19 }
 0x4d6   : > { %2267 = vpow2.f32 %v1959_v41 }
 0x4e3   : > { %v2268_v42 = vpop.eup %2267 }
 0x4e4   : > { %v1394_v43 = vadd.f32 1.0, %v2268_v42 }
 0x4e6   : > { %2269 = vrcp.f32 %v1394_v43 }
 0x4f3   : > { %v2270_v44 = vpop.eup %2269 }
 0x4f4   : > { %v1408_v56 = vsub.f32 1.0, %v2270_v44 }
 0x544   : > { %v1399_v45 = vpop.permute.xlu0 %1398 }
 0x545   : > { %v1401_v46 = vmul.f32 %v2270_v44, %v1399_v45 }
 0x547   : > { %1403 = vrot.lane.b32.xlu1 %v1401_v46, %s2703_s7 }
 0x54b   : > { %1414 = vrot.lane.b32.xlu1 %v3013_v10, %s2704_s26  ;;  %v1572_v10 = vld [vmem:[%s3284_s16] sm:$0xff]  ;;  %s3187_s26 = scalar_lea.sflag [#allocation25], %s1664_s9 }
 0x54c   : > { %2090 = vmatpush3.msra.mxu1 %v1572_v10 }
 0x54d   : > { %2092 = vmatmul.mubr.msk.f32.vlgmr.msra.gmra.mxu1 %vm1227_vm9, %v3090_v40 }
 0x5b9   : > { %v1404_v47 = vpop.permute.xlu1 %1403 }
 0x5ba   : > { %v1406_v48 = vadd.f32 %v1404_v47, %v1308_v39 }
 0x5bc   : > { %2271 = vtanh.f32 %v1406_v48 }
 0x5bd   : > { %v1415_v55 = vpop.permute.xlu1 %1414 }
 0x5be   : > { %v1417_v58 = vmul.f32 %v2270_v44, %v1415_v55 }
 0x5c9   : > { %v2272_v54 = vpop.eup %2271 }
 0x5ca   : > { %1410 = vrot.lane.b32.xlu0 %v2272_v54, %s2705_s29 }
 0x60d   : > { %v3175_v3 = vpop.f32.mrf.mxu1 }
 0x60f   : > { %v2093_v61 = vpop.f32.mrf.mxu1 }
 0x63c   : > { %v1411_v57 = vpop.permute.xlu0 %1410 }
 0x63d   : > { %v1413_v59 = vmul.f32 %v1411_v57, %v1408_v56 }
 0x63f   : > { %v1418_v60 = vadd.f32 %v1417_v58, %v1413_v59 }
 0x641   : > { %1498 = vrot.lane.b32.xlu0 %v1418_v60, %s2705_s29  ;;  %s2545_s29 = sshll.u32 %s2706_s28, 4  ;;  %s2546_s29 = int_to_ptr.vmem [resolvable:$false] %s2545_s29 }
 0x642   : > { %s2547_s3 = scalar_lea.vmem %s2546_s29, 128  ;;  %p2548_p2 = scmp.lt.s32.totalorder %s1697_s18, %s2546_s29 }
 0x643   : > { %p2549_p9 = scmp.lt.s32.totalorder %s2547_s3, %s2541_s24 }
 0x645   : > { %p2550_p13 = por %p2549_p9, %p2548_p2 }
 0x647   : > { %p2551_p10 = pnand %p2550_p13, %p2544_p1 }
 0x6b3   : > { %v1499_v40 = vpop.permute.xlu0 %1498 }
 0x6b4   : > { %1655 = vst.msk [vmem:[#allocation2] sm:$0xf] %vm1654_vm10, %v1499_v40  ;;  %1657 = vst.msk [vmem:[%s734_s14] sm:$0xf] %vm1654_vm10, %v1499_v40  ;;  %2085 = vmatmul.mubr.msk.f32.vlgmr.msra.gmra.mxu0 %vm787_vm2, %v1499_v40 }
 0x6b5   : > { %2554 = shalt.err (!%p2551_p10)
}
 0x6b6   : > { %s2555_s23 = scalar_lea.hbm %s1694_s0, 64  ;;  %s2559_s7 = scalar_lea.hbm %s3287_s19, 192 }
 0x6b7   : > { %p2556_p5 = scmp.ne.s32.totalorder %s1694_s0, %s2555_s23  ;;  %p2560_p3 = scmp.lt.s32.totalorder %s1694_s0, %s3287_s19 }
 0x6b8   : > { %p2561_p4 = scmp.lt.s32.totalorder %s2559_s7, %s2555_s23 }
 0x6b9   : > { %p2557_p6 = pnand %p2556_p5, %p3355_p0 }
 0x6ba   : > { %p2562_p7 = por %p2561_p4, %p2560_p3 }
 0x6bb   : > { %p2558_p11 = pneg %p2557_p6 }
 0x6bd   : > { %p2563_p8 = pnand %p2562_p7, %p2558_p11 }
 0x6bf   : > { %2566 = shalt.err (!%p2563_p8)
}
 0x6c0   : > { %2135 = dma.vmem_to_hbm [thread:$0]  (%p3355_p0), %s1697_s18, 64, %s1694_s0, %s3187_s26  }
 0x6c1   : > { %s1707_s29 = scalar_lea.hbm %s3288_s20, %s3179_s5  ;;  %s1709_s3 = sshll.u32 %s741_s22, 4  ;;  %s1710_s3 = int_to_ptr.vmem [resolvable:$true] %s1709_s3 }
 0x6c2   : > { %s2567_s25 = scalar_lea.vmem %s1710_s3, 64  ;;  %s2707_s4 = smov [#allocation26]  }
 0x6c3   : > { %p2568_p12 = scmp.ne.s32.totalorder %s1710_s3, %s2567_s25  ;;  %s2571_s23 = sshll.u32 %s2707_s4, 4  ;;  %s2572_s23 = int_to_ptr.vmem [resolvable:$false] %s2571_s23 }
 0x6c4   : > { %s2573_s14 = scalar_lea.vmem %s2572_s23, 128  ;;  %p2574_p9 = scmp.lt.s32.totalorder %s1710_s3, %s2572_s23 }
 0x6c5   : > { %p2569_p1 = pnand %p2568_p12, %p3355_p0  ;;  %p2575_p13 = scmp.lt.s32.totalorder %s2573_s14, %s2567_s25 }
 0x6c7   : > { %p2570_p2 = pneg %p2569_p1  ;;  %p2576_p10 = por %p2575_p13, %p2574_p9 }
 0x6c9   : > { %p2577_p5 = pnand %p2576_p10, %p2570_p2 }
 0x6cb   : > { %2580 = shalt.err (!%p2577_p5)
}
 0x6cc   : > { %s2581_s0 = scalar_lea.hbm %s1707_s29, 64  ;;  %s2585_s9 = scalar_lea.hbm %s3288_s20, 192 }
 0x6cd   : > { %p2582_p6 = scmp.ne.s32.totalorder %s1707_s29, %s2581_s0  ;;  %p2586_p4 = scmp.lt.s32.totalorder %s1707_s29, %s3288_s20 }
 0x6ce   : > { %p2587_p7 = scmp.lt.s32.totalorder %s2585_s9, %s2581_s0 }
 0x6cf   : > { %p2583_p11 = pnand %p2582_p6, %p3355_p0 }
 0x6d0   : > { %p2588_p8 = por %p2587_p7, %p2586_p4 }
 0x6d1   : > { %p2584_p3 = pneg %p2583_p11 }
 0x6d3   : > { %p2589_p12 = pnand %p2588_p8, %p2584_p3 }
 0x6d5   : > { %2592 = shalt.err (!%p2589_p12)
}
 0x6d6   : > { %2136 = dma.vmem_to_hbm [thread:$0]  (%p3355_p0), %s1710_s3, 64, %s1707_s29, %s3187_s26   ;;  %v1963_v62 = vld [vmem:[%s3285_s17] ss:$0 sm:$0xff] }
 0x6d7   : > { %s3356_s4 = scalar_lea.vmem [#allocation23], %s3001_s21  ;;  %s3357_s22 = sld [smem:[#allocation51_spill]] }
 0x6d8   : > { %s1683_s23 = sshll.u32 %s3356_s4, 4  ;;  %s3358_s26 = smov %s3356_s4  ;;  %s1684_s23 = int_to_ptr.vmem [resolvable:$true] %s1683_s23 }
 0x6d9   : > { %s3359_s29 = sand.u32 1, %s2675_s2   ;;  %s2593_s9 = scalar_lea.vmem %s1684_s23, 64 }
 0x6da   : > { %s1660_s3 = scalar_lea.sflag [#allocation8], %s3359_s29  ;;  %p2594_p1 = scmp.ne.s32.totalorder %s1684_s23, %s2593_s9 }
 0x6db   : > { %s2708_s7 = smov [#allocation23]  }
 0x6dc   : > { %p2595_p2 = pnand %p2594_p1, %p3355_p0  ;;  %s2597_s24 = sshll.u32 %s2708_s7, 4  ;;  %s2598_s24 = int_to_ptr.vmem [resolvable:$false] %s2597_s24 }
 0x6dd   : > { %s1681_s18 = scalar_lea.hbm %s3357_s22, %s3179_s5  ;;  %s2599_s28 = scalar_lea.vmem %s2598_s24, 128 }
 0x6de   : > { %p2596_p9 = pneg %p2595_p2  ;;  %p2600_p13 = scmp.lt.s32.totalorder %s1684_s23, %s2598_s24 }
 0x6df   : > { %p2601_p10 = scmp.lt.s32.totalorder %s2599_s28, %s2593_s9 }
 0x6e1   : > { %p2602_p5 = por %p2601_p10, %p2600_p13 }
 0x6e3   : > { %p2603_p6 = pnand %p2602_p5, %p2596_p9 }
 0x774   : > { %v1568_v12 = vpop.f32.mrf.mxu0 }
 0x775   : > { %v1569_v11 = vadd.f32 %v1568_v12, %v3137_v31 }
 0x776   : > { %v2086_v63 = vpop.f32.mrf.mxu0 }
 0x777   : > { %v1644_v0 = vadd.f32 %v3175_v3, %v1569_v11 }
 0x779   : > { %v1652_v1 = vadd.f32 %v1963_v62, %v1644_v0 }
 0x77b   : > { %1656 = vst.msk [vmem:[%s3358_s26] sm:$0xf] %vm1654_vm10, %v1652_v1 }
 0x77c   : > { %2606 = shalt.err (!%p2603_p6)
}
 0x77d   : > { %s2607_s5 = scalar_lea.hbm %s1681_s18, 64  ;;  %s2611_s4 = scalar_lea.hbm %s3357_s22, 192 }
 0x77e   : > { %p2608_p11 = scmp.ne.s32.totalorder %s1681_s18, %s2607_s5  ;;  %p2612_p7 = scmp.lt.s32.totalorder %s1681_s18, %s3357_s22 }
 0x77f   : > { %p2613_p8 = scmp.lt.s32.totalorder %s2611_s4, %s2607_s5 }
 0x780   : > { %p2609_p3 = pnand %p2608_p11, %p3355_p0 }
 0x781   : > { %p2614_p12 = por %p2613_p8, %p2612_p7 }
 0x782   : > { %p2610_p4 = pneg %p2609_p3 }
 0x784   : > { %p2615_p1 = pnand %p2614_p12, %p2610_p4 }
 0x786   : > { %2618 = shalt.err (!%p2615_p1)
}
 0x787   : > { %2134 = dma.vmem_to_hbm [thread:$0]  (%p3355_p0), %s1684_s23, 64, %s1681_s18, %s1660_s3  }
 0x788 PF: > { %s3360_s26 = sld [smem:[#allocation38_spill]] }
 0x789   : > { %s3361_s29 = sld [smem:[#allocation36_spill]] }
 0x78a   : > { %s3362_s9 = sld [smem:[#allocation41_spill]] }
 0x78e   : > { %p2201_p2 = scmp.ge.s32.totalorder %s3360_s26, 2 }
 0x78f   : > { %s1721_s7 = sand.u32 1, %s3361_s29  }
 0x790   : > { %p3363_p9 = scmp.ne.s32.totalorder %s3362_s9, 0  ;;  %s1722_s24 = scalar_lea.sflag [#allocation8], %s1721_s7 }
 0x792   : > { %p2172_p13 = pnand %p2201_p2, %p3363_p9 }
 0x794   : > { %p2173_p10 = pneg %p2172_p13 }
 0x796   : > { %2662 = dma.done.wait (%p2173_p10), %s1722_s24, 64  }
 0x797   : > { %2664 = vsyncadd (%p2173_p10), %s1722_s24, 4294967232  ;;  %s3364_s28 = sadd.s32 4294967294, %s3360_s26  }
 0x798   : > { %s1730_s5 = sand.u32 1, %s3364_s28  }
 0x799   : > { %s1731_s21 = scalar_lea.sflag [#allocation25], %s1730_s5 }
 0x79a   : > { %2666 = dma.done.wait (%p2173_p10), %s1731_s21, 128  }
 0x79b   : > { %2668 = vsyncadd (%p2173_p10), %s1731_s21, 4294967168  ;;  %s3365_s14 = sld [smem:[#allocation39_spill]]  ;;  %s3368_s24 = smov %s2675_s2 }
 0x79c   : > { %s3366_s30 = sld [smem:[#allocation37_spill]] }
 0x79d   : > { %s3367_s25 = sld [smem:[#allocation40_spill]] }
 0x7a1   : > { %p44_p0 = scmp.ge.s32.totalorder %s3365_s14, 5  }
 0x7a2   : > { %s3369_s2 = smov %s3366_s30 }
 0x7a3   :  { %46 = sbr.rel (!%p44_p0) target bundleno = 32 (0x20), region = 201 }
 0x7a8   :  { %1745 = vsyncpa [#allocation7], 1 }
 0x7a9   :  { %1747 = vsyncpa [#allocation7 + $0x1], 1 }
 0x7aa   :  { %1748 = vsyncpa [#allocation10], 1 }
 0x7ab   :  { %1749 = vsyncpa [#allocation13], 1 }
 0x7ac   :  { %1750 = vsyncpa [#allocation16], 1 }
 0x7ad   :  { %1751 = vsyncpa [#allocation19], 1 }
 0x7ae   :  { %1752 = vsyncpa [#allocation22], 1 }
 0x7af   :  { %1753 = vsyncpa [#allocation8], 1 }
 0x7b0   :  { %1755 = vsyncpa [#allocation8 + $0x1], 1 }
 0x7b1   :  { %1756 = vsyncpa [#allocation25], 1 }
 0x7b2   :  { %1758 = vsyncpa [#allocation25 + $0x1], 1 }

</bundles_post_ra>
